<compile_context>
chip_gen: v6e
topology: v6e:2x2x1
jax: 0.10.0
libtpu: 0.0.40
codegen_flags: <defaults>
</compile_context>

<pallas_src>
import math

import jax
import jax.numpy as jnp
from jax.experimental import pallas as pl
from jax.experimental.pallas import tpu as pltpu


def _merge_feature_kernel(a1_ref, a2_ref, a3_ref, w1_ref, w2_ref, w3_ref,
                          b_ref, wc_ref, o_ref):
    """One (batch, HW-tile) grid step: three 3x3-conv branches (im2col matmuls)
    + bias + ReLU, fused with the 1x1 compress conv (per-branch FxF matmul + sum)."""
    acc = None
    for bi, (a_ref, w_ref) in enumerate(((a1_ref, w1_ref),
                                         (a2_ref, w2_ref),
                                         (a3_ref, w3_ref))):
        # (TILE, 9C) bf16 @ (9C, F) bf16 -> f32 accumulation on the MXU.
        z = jnp.dot(a_ref[0], w_ref[...], preferred_element_type=jnp.float32)
        z = jnp.maximum(z + b_ref[bi:bi + 1, :], 0.0).astype(jnp.bfloat16)
        # compress 1x1 conv, this branch's FxF slice: (TILE, F) @ (F, F) -> f32.
        y = jnp.dot(z, wc_ref[bi], preferred_element_type=jnp.float32)
        acc = y if acc is None else acc + y
    o_ref[0] = acc + b_ref[3:4, :]          # compress bias; lane-dense (TILE, F) store


def _im2col_3x3(x_nchw, stride, Ho, Wo):
    """3x3 / pad-1 / given-stride im2col -> (N, Ho*Wo, 9*C) bf16, tap-major layout:
    channel index = (3*di + dj)*C + c."""
    N, C, _, _ = x_nchw.shape
    xh = jnp.transpose(jnp.pad(x_nchw.astype(jnp.bfloat16),
                               ((0, 0), (0, 0), (1, 1), (1, 1))),
                       (0, 2, 3, 1))                               # (N, H+2, W+2, C)
    taps = []
    for di in range(3):
        for dj in range(3):
            p = xh[:, di:di + stride * (Ho - 1) + 1:stride,
                      dj:dj + stride * (Wo - 1) + 1:stride, :]     # (N, Ho, Wo, C)
            taps.append(p.reshape(N, Ho * Wo, C))
    return jnp.concatenate(taps, axis=-1)                          # (N, HW, 9C)


def _pack_params(w1, w2, w3, wc, b1, b2, b3, bc):
    F = w1.shape[0]
    C = w1.shape[1]

    def pack3x3(w):   # (F, C, 3, 3) -> (9C, F), matching the tap-major im2col layout
        return jnp.transpose(w, (2, 3, 1, 0)).reshape(9 * C, F).astype(jnp.bfloat16)

    w1p, w2p, w3p = pack3x3(w1), pack3x3(w2), pack3x3(w3)

    # compress 1x1 conv: split (F, 3F) into three (F, F) pieces transposed for x @ W.
    wc2 = wc.reshape(F, 3 * F)
    wcp = jnp.stack([wc2[:, 0:F].T, wc2[:, F:2 * F].T, wc2[:, 2 * F:].T]
                    ).astype(jnp.bfloat16)                         # (3, F, F)
    b_all = jnp.stack([b1, b2, b3, bc]).astype(jnp.float32)        # (4, F)
    return w1p, w2p, w3p, b_all, wcp


def merge_feature_forward(x1, x2, x3, params, *, max_tile_hw=512):
    w1, b1, w2, b2, w3, b3, wc, bc = params
    N, C, H3, W3 = x3.shape
    F = w1.shape[0]
    Ho, Wo = H3, W3                                     # stride-1 branch keeps size
    assert (x1.shape[2] - 1) // 4 + 1 == Ho and (x1.shape[3] - 1) // 4 + 1 == Wo
    assert (x2.shape[2] - 1) // 2 + 1 == Ho and (x2.shape[3] - 1) // 2 + 1 == Wo
    HW = Ho * Wo

    # HW tiling: >=2 grid steps even at N=1 (v7x megacore), tile a multiple of 8,
    # capped at max_tile_hw so per-step VMEM stays well inside v7x's 64 MiB.
    tile = min(max_tile_hw, max(8, ((HW + 1) // 2 + 7) // 8 * 8))
    n_tiles = -(-HW // tile)
    HW_pad = n_tiles * tile

    def prep(x, stride):
        a = _im2col_3x3(x, stride, Ho, Wo)
        if HW_pad != HW:
            a = jnp.pad(a, ((0, 0), (0, HW_pad - HW), (0, 0)))
        return a

    a1, a2, a3 = prep(x1, 4), prep(x2, 2), prep(x3, 1)
    w1p, w2p, w3p, b_all, wcp = _pack_params(w1, w2, w3, wc, b1, b2, b3, bc)
    K = 9 * C

    out = pl.pallas_call(
        _merge_feature_kernel,
        out_shape=jax.ShapeDtypeStruct((N, HW_pad, F), jnp.float32),
        grid_spec=pltpu.PrefetchScalarGridSpec(
            num_scalar_prefetch=0,
            grid=(N, n_tiles),
            in_specs=[
                pl.BlockSpec((1, tile, K), lambda n, t: (n, t, 0)),
                pl.BlockSpec((1, tile, K), lambda n, t: (n, t, 0)),
                pl.BlockSpec((1, tile, K), lambda n, t: (n, t, 0)),
                pl.BlockSpec((K, F), lambda n, t: (0, 0)),
                pl.BlockSpec((K, F), lambda n, t: (0, 0)),
                pl.BlockSpec((K, F), lambda n, t: (0, 0)),
                pl.BlockSpec((4, F), lambda n, t: (0, 0)),
                pl.BlockSpec((3, F, F), lambda n, t: (0, 0, 0)),
            ],
            out_specs=pl.BlockSpec((1, tile, F), lambda n, t: (n, t, 0)),
        ),
        compiler_params=pltpu.CompilerParams(
            dimension_semantics=("parallel", "parallel"),
            vmem_limit_bytes=48 * 1024 * 1024),
    )(a1, a2, a3, w1p, w2p, w3p, b_all, wcp)

    # (N, HW_pad, F) -> NCHW to match the PyTorch module's output layout.
    out = out[:, :HW, :].reshape(N, Ho, Wo, F)
    return jnp.transpose(out, (0, 3, 1, 2))


def _reference(x1, x2, x3, params):
    """Pure-JAX f32 reference mirroring the PyTorch ops step by step."""
    w1, b1, w2, b2, w3, b3, wc, bc = params
    dn = ('NCHW', 'OIHW', 'NCHW')

    def conv(x, w, b, s, p):
        y = jax.lax.conv_general_dilated(
            x, w, window_strides=(s, s), padding=[(p, p), (p, p)],
            dimension_numbers=dn)
        return y + b[None, :, None, None]

    o1 = jax.nn.relu(conv(x1, w1, b1, 4, 1))
    o2 = jax.nn.relu(conv(x2, w2, b2, 2, 1))
    o3 = jax.nn.relu(conv(x3, w3, b3, 1, 1))
    cat = jnp.concatenate([o1, o2, o3], axis=1)
    return conv(cat, wc, bc, 1, 0)


if __name__ == "__main__":
    key = jax.random.PRNGKey(0)
    ks = jax.random.split(key, 11)

    # feature_size=256 is implied by the hard-coded 768 = 3*256 in conv_compress;
    # num_features_in and spatial sizes kept small.
    N, Cin, Fs = 2, 64, 256
    H = W = 8                                          # spatial size of merged map
    x1 = jax.random.normal(ks[0], (N, Cin, 4 * H, 4 * W), jnp.float32)
    x2 = jax.random.normal(ks[1], (N, Cin, 2 * H, 2 * W), jnp.float32)
    x3 = jax.random.normal(ks[2], (N, Cin, H, W), jnp.float32)

    def init_conv(kw, kb, cout, cin, k):
        bound = 1.0 / math.sqrt(cin * k * k)
        w = jax.random.uniform(kw, (cout, cin, k, k), jnp.float32, -bound, bound)
        b = jax.random.uniform(kb, (cout,), jnp.float32, -bound, bound)
        return w, b

    w1, b1 = init_conv(ks[3], ks[4], Fs, Cin, 3)
    w2, b2 = init_conv(ks[5], ks[6], Fs, Cin, 3)
    w3, b3 = init_conv(ks[7], ks[8], Fs, Cin, 3)
    wc, bc = init_conv(ks[9], ks[10], Fs, 3 * Fs, 1)
    params = (w1, b1, w2, b2, w3, b3, wc, bc)

    fwd = jax.jit(lambda a, b, c, p: merge_feature_forward(a, b, c, p))
    out = jax.block_until_ready(fwd(x1, x2, x3, params))
    ref = jax.block_until_ready(_reference(x1, x2, x3, params))

    assert out.shape == (N, Fs, H, W)
    # Tolerance covers bf16 MXU operands (f32 accumulation); f32-only path is ~1e-5.
    err = float(jnp.max(jnp.abs(out - ref)) / (jnp.max(jnp.abs(ref)) + 1e-6))
    assert err < 2e-2, f"max relative error too large: {err}"
    print("KERNEL_OK")
</pallas_src>

<mosaic_0001>
module attributes {stable_mosaic.version = 11 : i64} {
  func.func @_merge_feature_kernel(%arg0: i32, %arg1: i32, %arg2: memref<1x32x576xbf16, #tpu.memory_space<vmem>>, %arg3: memref<1x32x576xbf16, #tpu.memory_space<vmem>>, %arg4: memref<1x32x576xbf16, #tpu.memory_space<vmem>>, %arg5: memref<576x256xbf16, #tpu.memory_space<vmem>>, %arg6: memref<576x256xbf16, #tpu.memory_space<vmem>>, %arg7: memref<576x256xbf16, #tpu.memory_space<vmem>>, %arg8: memref<4x256xf32, #tpu.memory_space<vmem>>, %arg9: memref<3x256x256xbf16, #tpu.memory_space<vmem>>, %arg10: memref<1x32x256xf32, #tpu.memory_space<vmem>>) attributes {dimension_semantics = [#tpu.dimension_semantics<parallel>, #tpu.dimension_semantics<parallel>], iteration_bounds = array<i64: 2, 2>, scalar_prefetch = 0 : i64, scratch_operands = 0 : i64, tpu.core_type = #tpu.core_type<tc>, window_params = [{transform_indices = @transform_0, window_bounds = array<i64: 1, 32, 576>}, {transform_indices = @transform_1, window_bounds = array<i64: 1, 32, 576>}, {transform_indices = @transform_2, window_bounds = array<i64: 1, 32, 576>}, {pipeline_mode = #tpu.pipeline_mode<synchronous>, transform_indices = @transform_3, window_bounds = array<i64: 576, 256>}, {pipeline_mode = #tpu.pipeline_mode<synchronous>, transform_indices = @transform_4, window_bounds = array<i64: 576, 256>}, {pipeline_mode = #tpu.pipeline_mode<synchronous>, transform_indices = @transform_5, window_bounds = array<i64: 576, 256>}, {pipeline_mode = #tpu.pipeline_mode<synchronous>, transform_indices = @transform_6, window_bounds = array<i64: 4, 256>}, {pipeline_mode = #tpu.pipeline_mode<synchronous>, transform_indices = @transform_7, window_bounds = array<i64: 3, 256, 256>}, {transform_indices = @transform_8, window_bounds = array<i64: 1, 32, 256>}]} {
    %c0 = arith.constant 0 : index
    %c0_0 = arith.constant 0 : index
    %c0_1 = arith.constant 0 : index
    %0 = vector.load %arg2[%c0, %c0_0, %c0_1] : memref<1x32x576xbf16, #tpu.memory_space<vmem>>, vector<1x32x576xbf16>
    %1 = vector.shape_cast %0 : vector<1x32x576xbf16> to vector<32x576xbf16>
    %c0_2 = arith.constant 0 : index
    %c0_3 = arith.constant 0 : index
    %2 = vector.load %arg5[%c0_2, %c0_3] : memref<576x256xbf16, #tpu.memory_space<vmem>>, vector<576x256xbf16>
    %cst = arith.constant dense<0.000000e+00> : vector<32x256xf32>
    %3 = tpu.matmul %1, %2, %cst {dimension_numbers = #tpu.dot_dimension_numbers<[1], [0], [0], [1], [0, 0, 1, 1], [], []>} : vector<32x576xbf16>, vector<576x256xbf16>, vector<32x256xf32> -> vector<32x256xf32>
    %c0_4 = arith.constant 0 : index
    %c0_5 = arith.constant 0 : index
    %4 = vector.load %arg8[%c0_4, %c0_5] : memref<4x256xf32, #tpu.memory_space<vmem>>, vector<1x256xf32>
    %5 = vector.broadcast %4 : vector<1x256xf32> to vector<32x256xf32>
    %6 = arith.addf %3, %5 : vector<32x256xf32>
    %cst_6 = arith.constant 0.000000e+00 : f32
    %7 = vector.broadcast %cst_6 : f32 to vector<32x256xf32>
    %8 = arith.maximumf %6, %7 : vector<32x256xf32>
    %9 = arith.truncf %8 : vector<32x256xf32> to vector<32x256xbf16>
    %c0_7 = arith.constant 0 : index
    %c0_8 = arith.constant 0 : index
    %c0_9 = arith.constant 0 : index
    %10 = vector.load %arg9[%c0_7, %c0_8, %c0_9] : memref<3x256x256xbf16, #tpu.memory_space<vmem>>, vector<1x256x256xbf16>
    %11 = vector.shape_cast %10 : vector<1x256x256xbf16> to vector<256x256xbf16>
    %cst_10 = arith.constant dense<0.000000e+00> : vector<32x256xf32>
    %12 = tpu.matmul %9, %11, %cst_10 {dimension_numbers = #tpu.dot_dimension_numbers<[1], [0], [0], [1], [0, 0, 1, 1], [], []>} : vector<32x256xbf16>, vector<256x256xbf16>, vector<32x256xf32> -> vector<32x256xf32>
    %c0_11 = arith.constant 0 : index
    %c0_12 = arith.constant 0 : index
    %c0_13 = arith.constant 0 : index
    %13 = vector.load %arg3[%c0_11, %c0_12, %c0_13] : memref<1x32x576xbf16, #tpu.memory_space<vmem>>, vector<1x32x576xbf16>
    %14 = vector.shape_cast %13 : vector<1x32x576xbf16> to vector<32x576xbf16>
    %c0_14 = arith.constant 0 : index
    %c0_15 = arith.constant 0 : index
    %15 = vector.load %arg6[%c0_14, %c0_15] : memref<576x256xbf16, #tpu.memory_space<vmem>>, vector<576x256xbf16>
    %cst_16 = arith.constant dense<0.000000e+00> : vector<32x256xf32>
    %16 = tpu.matmul %14, %15, %cst_16 {dimension_numbers = #tpu.dot_dimension_numbers<[1], [0], [0], [1], [0, 0, 1, 1], [], []>} : vector<32x576xbf16>, vector<576x256xbf16>, vector<32x256xf32> -> vector<32x256xf32>
    %c1 = arith.constant 1 : index
    %c0_17 = arith.constant 0 : index
    %17 = vector.load %arg8[%c1, %c0_17] : memref<4x256xf32, #tpu.memory_space<vmem>>, vector<1x256xf32>
    %18 = vector.broadcast %17 : vector<1x256xf32> to vector<32x256xf32>
    %19 = arith.addf %16, %18 : vector<32x256xf32>
    %cst_18 = arith.constant 0.000000e+00 : f32
    %20 = vector.broadcast %cst_18 : f32 to vector<32x256xf32>
    %21 = arith.maximumf %19, %20 : vector<32x256xf32>
    %22 = arith.truncf %21 : vector<32x256xf32> to vector<32x256xbf16>
    %c1_19 = arith.constant 1 : index
    %c0_20 = arith.constant 0 : index
    %c0_21 = arith.constant 0 : index
    %23 = vector.load %arg9[%c1_19, %c0_20, %c0_21] : memref<3x256x256xbf16, #tpu.memory_space<vmem>>, vector<1x256x256xbf16>
    %24 = vector.shape_cast %23 : vector<1x256x256xbf16> to vector<256x256xbf16>
    %cst_22 = arith.constant dense<0.000000e+00> : vector<32x256xf32>
    %25 = tpu.matmul %22, %24, %cst_22 {dimension_numbers = #tpu.dot_dimension_numbers<[1], [0], [0], [1], [0, 0, 1, 1], [], []>} : vector<32x256xbf16>, vector<256x256xbf16>, vector<32x256xf32> -> vector<32x256xf32>
    %26 = arith.addf %12, %25 : vector<32x256xf32>
    %c0_23 = arith.constant 0 : index
    %c0_24 = arith.constant 0 : index
    %c0_25 = arith.constant 0 : index
    %27 = vector.load %arg4[%c0_23, %c0_24, %c0_25] : memref<1x32x576xbf16, #tpu.memory_space<vmem>>, vector<1x32x576xbf16>
    %28 = vector.shape_cast %27 : vector<1x32x576xbf16> to vector<32x576xbf16>
    %c0_26 = arith.constant 0 : index
    %c0_27 = arith.constant 0 : index
    %29 = vector.load %arg7[%c0_26, %c0_27] : memref<576x256xbf16, #tpu.memory_space<vmem>>, vector<576x256xbf16>
    %cst_28 = arith.constant dense<0.000000e+00> : vector<32x256xf32>
    %30 = tpu.matmul %28, %29, %cst_28 {dimension_numbers = #tpu.dot_dimension_numbers<[1], [0], [0], [1], [0, 0, 1, 1], [], []>} : vector<32x576xbf16>, vector<576x256xbf16>, vector<32x256xf32> -> vector<32x256xf32>
    %c2 = arith.constant 2 : index
    %c0_29 = arith.constant 0 : index
    %31 = vector.load %arg8[%c2, %c0_29] : memref<4x256xf32, #tpu.memory_space<vmem>>, vector<1x256xf32>
    %32 = vector.broadcast %31 : vector<1x256xf32> to vector<32x256xf32>
    %33 = arith.addf %30, %32 : vector<32x256xf32>
    %cst_30 = arith.constant 0.000000e+00 : f32
    %34 = vector.broadcast %cst_30 : f32 to vector<32x256xf32>
    %35 = arith.maximumf %33, %34 : vector<32x256xf32>
    %36 = arith.truncf %35 : vector<32x256xf32> to vector<32x256xbf16>
    %c2_31 = arith.constant 2 : index
    %c0_32 = arith.constant 0 : index
    %c0_33 = arith.constant 0 : index
    %37 = vector.load %arg9[%c2_31, %c0_32, %c0_33] : memref<3x256x256xbf16, #tpu.memory_space<vmem>>, vector<1x256x256xbf16>
    %38 = vector.shape_cast %37 : vector<1x256x256xbf16> to vector<256x256xbf16>
    %cst_34 = arith.constant dense<0.000000e+00> : vector<32x256xf32>
    %39 = tpu.matmul %36, %38, %cst_34 {dimension_numbers = #tpu.dot_dimension_numbers<[1], [0], [0], [1], [0, 0, 1, 1], [], []>} : vector<32x256xbf16>, vector<256x256xbf16>, vector<32x256xf32> -> vector<32x256xf32>
    %40 = arith.addf %26, %39 : vector<32x256xf32>
    %c3 = arith.constant 3 : index
    %c0_35 = arith.constant 0 : index
    %41 = vector.load %arg8[%c3, %c0_35] : memref<4x256xf32, #tpu.memory_space<vmem>>, vector<1x256xf32>
    %42 = vector.broadcast %41 : vector<1x256xf32> to vector<32x256xf32>
    %43 = arith.addf %40, %42 : vector<32x256xf32>
    %c0_36 = arith.constant 0 : index
    %c0_37 = arith.constant 0 : index
    %c0_38 = arith.constant 0 : index
    %44 = vector.load %arg10[%c0_36, %c0_37, %c0_38] : memref<1x32x256xf32, #tpu.memory_space<vmem>>, vector<1x32x256xf32>
    %45 = vector.shape_cast %44 : vector<1x32x256xf32> to vector<32x256xf32>
    %46 = vector.shape_cast %43 : vector<32x256xf32> to vector<1x32x256xf32>
    tpu.vector_store %arg10[%c0_36, %c0_37, %c0_38], %46 {strides = array<i32>} : memref<1x32x256xf32, #tpu.memory_space<vmem>>, vector<1x32x256xf32>,
    return
  }
  func.func @transform_0(%arg0: i32, %arg1: i32) -> (i32, i32, i32) {
    %c0_i32 = arith.constant 0 : i32
    %c0_i32_0 = arith.constant 0 : i32
    return %arg0, %arg1, %c0_i32 : i32, i32, i32
  }
  func.func @transform_1(%arg0: i32, %arg1: i32) -> (i32, i32, i32) {
    %c0_i32 = arith.constant 0 : i32
    %c0_i32_0 = arith.constant 0 : i32
    return %arg0, %arg1, %c0_i32 : i32, i32, i32
  }
  func.func @transform_2(%arg0: i32, %arg1: i32) -> (i32, i32, i32) {
    %c0_i32 = arith.constant 0 : i32
    %c0_i32_0 = arith.constant 0 : i32
    return %arg0, %arg1, %c0_i32 : i32, i32, i32
  }
  func.func @transform_3(%arg0: i32, %arg1: i32) -> (i32, i32) {
    %c0_i32 = arith.constant 0 : i32
    %c0_i32_0 = arith.constant 0 : i32
    %c0_i32_1 = arith.constant 0 : i32
    return %c0_i32, %c0_i32_0 : i32, i32
  }
  func.func @transform_4(%arg0: i32, %arg1: i32) -> (i32, i32) {
    %c0_i32 = arith.constant 0 : i32
    %c0_i32_0 = arith.constant 0 : i32
    %c0_i32_1 = arith.constant 0 : i32
    return %c0_i32, %c0_i32_0 : i32, i32
  }
  func.func @transform_5(%arg0: i32, %arg1: i32) -> (i32, i32) {
    %c0_i32 = arith.constant 0 : i32
    %c0_i32_0 = arith.constant 0 : i32
    %c0_i32_1 = arith.constant 0 : i32
    return %c0_i32, %c0_i32_0 : i32, i32
  }
  func.func @transform_6(%arg0: i32, %arg1: i32) -> (i32, i32) {
    %c0_i32 = arith.constant 0 : i32
    %c0_i32_0 = arith.constant 0 : i32
    %c0_i32_1 = arith.constant 0 : i32
    return %c0_i32, %c0_i32_0 : i32, i32
  }
  func.func @transform_7(%arg0: i32, %arg1: i32) -> (i32, i32, i32) {
    %c0_i32 = arith.constant 0 : i32
    %c0_i32_0 = arith.constant 0 : i32
    %c0_i32_1 = arith.constant 0 : i32
    %c0_i32_2 = arith.constant 0 : i32
    return %c0_i32, %c0_i32_0, %c0_i32_1 : i32, i32, i32
  }
  func.func @transform_8(%arg0: i32, %arg1: i32) -> (i32, i32, i32) {
    %c0_i32 = arith.constant 0 : i32
    %c0_i32_0 = arith.constant 0 : i32
    return %arg0, %arg1, %c0_i32 : i32, i32, i32
  }
}

</mosaic_0001>

<bundles_post_ra>
// kernel: _lambda_.1
= control target key start
LH: loop header
LB: loop body
LE: loop exit
PB: predicated region body
PF: predicated region fallthrough
CT: control target
= control target key end

     0   :  { %13 = vsyncpa [#allocation3], 0  ;;  %s5768_s0 = inlined_call_operand.vmem [shape: bf16[2,64,576], index: 0, kind: input, shape index: {}]   ;;  %s5769_s1 = inlined_call_operand.vmem [shape: bf16[2,64,576], index: 1, kind: input, shape index: {}]   ;;  %s5770_s2 = inlined_call_operand.vmem [shape: bf16[2,64,576], index: 2, kind: input, shape index: {}]   ;;  %s5771_s3 = inlined_call_operand.vmem [shape: bf16[576,256], index: 3, kind: input, shape index: {}]   ;;  %s5772_s4 = inlined_call_operand.vmem [shape: bf16[576,256], index: 4, kind: input, shape index: {}]   ;;  %s5773_s5 = inlined_call_operand.vmem [shape: bf16[576,256], index: 5, kind: input, shape index: {}]   ;;  %s5774_s6 = inlined_call_operand.vmem [shape: f32[4,256], index: 6, kind: input, shape index: {}]   ;;  %s5775_s7 = inlined_call_operand.vmem [shape: bf16[3,256,256], index: 7, kind: input, shape index: {}]   ;;  %s5776_s8 = inlined_call_operand.hbm [shape: f32[2,64,256], index: 8, kind: output, shape index: {}]  }
   0x1   :  { %15 = vsyncpa [#allocation3 + $0x1], 0  ;;  %s4551_s27 = smov 0   ;;  %s4553_s28 = smov 0  }
   0x2   :  { %s4555_s29 = smov 0   ;;  %s4557_s30 = smov 0  }
   0x3   :  { %s4559_s9 = smov 0   ;;  %s4561_s10 = smov 0  }
   0x4   :  { %s4563_s11 = smov 0   ;;  %s4565_s12 = smov 0  }
   0x5 LB: > { %5780 = sst [smem:[#allocation5_spill]] %s4496_s11  ;;  %s3387_s13 = sadd.s32 4294967295, %s4500_s12   ;;  %s4500_s12 = sphi %s4565_s12, %s21_s12   ;;  %s4496_s11 = sphi %s4563_s11, %s5787_s11   ;;  %s4492_s10 = sphi %s4561_s10, %s5792_s10   ;;  %s4488_s9 = sphi %s4559_s9, %s5785_s9   ;;  %s4484_s30 = sphi %s4557_s30, %s5791_s30   ;;  %s4480_s29 = sphi %s4555_s29, %s5790_s29   ;;  %s4476_s28 = sphi %s4553_s28, %s5789_s28   ;;  %s4472_s27 = sphi %s4551_s27, %s5788_s27  }
   0x6   : > { %s3388_s14 = sadd.s32 4294967294, %s4500_s12   ;;  %s30_s15 = sadd.s32 1, %s4492_s10 }
   0x7   : > { %p31_p0 = scmp.ge.s32.totalorder %s30_s15, 2  ;;  %s33_s16 = sadd.s32 1, %s4496_s11 }
   0x8   : > { %p241_p1 = scmp.ne.s32.totalorder %s4480_s29, %s4476_s28  ;;  %p242_p2 = scmp.eq.s32.totalorder %s3387_s13, 3 }
   0x9   : > { %s5794_s15 = smov (%p31_p0, %s30_s15), 0  ;;  %s5796_s16 = smov (!%p31_p0, %s33_s16), %s4496_s11 }
   0xa   : > { %5781 = sst [smem:[#allocation6_spill]] %s5794_s15  ;;  %s227_s17 = ssub.s32 %s4492_s10, %s5794_s15 }
   0xb   : > { %p4602_p3 = por %p242_p2, %p241_p1  ;;  %p35_p4 = scmp.ge.s32.totalorder %s5796_s16, 2 }
   0xc   : > { %p247_p5 = scmp.ne.s32.totalorder %s4476_s28, %s4472_s27  ;;  %p248_p6 = scmp.eq.s32.totalorder %s3388_s14, 3 }
   0xd   : > { %p3391_p7 = scmp.ge.s32.totalorder %s4500_s12, 1  ;;  %s5798_s16 = smov (%p35_p4, %s5796_s16), 0 }
   0xe   : > { %5783 = sst [smem:[#allocation7_spill]] %s5798_s16  ;;  %p4611_p8 = por %p248_p6, %p247_p5 }
   0xf   : > { %p323_p9 = scmp.lt.s32.totalorder %s4500_s12, 5  ;;  %s226_s20 = ssub.s32 %s4496_s11, %s5798_s16 }
  0x10   : > { %s231_s21 = sadd.s32 1, %s4480_s29  ;;  %s228_s22 = sor.u32 %s227_s17, %s226_s20 }
  0x11   : > { %p324_p10 = pnand %p3391_p7, %p323_p9  ;;  %p229_p11 = scmp.eq.s32.totalorder %s228_s22, 0 }
  0x12   : > { %s3393_s26 = sshll.u32 (!%p324_p10), %s4484_s30, 2  ;;  %p383_p12 = scmp.lt.s32.totalorder (!%p324_p10), %s4488_s9, 1 }
  0x13   : > { %s4620_s23 = scalar_select %p229_p11, %s4480_s29, %s231_s21  }
  0x14   : > { %327 = sbr.rel (%p324_p10) target bundleno = 903 (0x387), region = 52  ;;  %p385_p13 = scmp.lt.s32.totalorder (!%p324_p10), %s3393_s26, 7 }
  0x15   : > { %s3817_s21 = sshll.u32 (!%p324_p10), %s4488_s9, 4 }
  0x19   : > { %v3898_v0 = vld [vmem:[%s5771_s3 + $0x74] ss:$8 sps:$4 sm:$0xff]   ;;  %v3900_v1 = vld [vmem:[%s5771_s3 + $0x70] ss:$8 sps:$4 sm:$0xff]   ;;  %v3904_v4 = vld [vmem:[%s5771_s3 + $0x64] ss:$8 sps:$4 sm:$0xff]  }
  0x1a   : > { %930 = vmatprep.subr.bf16.mxu0 %v3898_v0  ;;  %v3901_v2 = vld [vmem:[%s5771_s3 + $0x174] ss:$8 sps:$4 sm:$0xff]   ;;  %v3903_v3 = vld [vmem:[%s5771_s3 + $0x170] ss:$8 sps:$4 sm:$0xff]   ;;  %v3906_v5 = vld [vmem:[%s5771_s3 + $0x60] ss:$8 sps:$4 sm:$0xff]  }
  0x1b   : > { %931 = vmatpush1.bf16.msra.mxu0 %v3900_v1  ;;  %983 = vmatprep.subr.bf16.mxu1 %v3901_v2  ;;  %v3907_v6 = vld [vmem:[%s5771_s3 + $0x164] ss:$8 sps:$4 sm:$0xff]   ;;  %v3909_v7 = vld [vmem:[%s5771_s3 + $0x160] ss:$8 sps:$4 sm:$0xff]   ;;  %v3910_v8 = vld [vmem:[%s5771_s3 + $0x54] ss:$8 sps:$4 sm:$0xff]  }
  0x1c   : > { %984 = vmatpush1.bf16.msra.mxu1 %v3903_v3  ;;  %932 = vmatprep.subr.bf16.mxu0 %v3904_v4  ;;  %v3912_v9 = vld [vmem:[%s5771_s3 + $0x50] ss:$8 sps:$4 sm:$0xff]   ;;  %v3913_v10 = vld [vmem:[%s5771_s3 + $0x154] ss:$8 sps:$4 sm:$0xff]   ;;  %v3916_v11 = vld [vmem:[%s5771_s3 + $0x44] ss:$8 sps:$4 sm:$0xff]  }
  0x1d   : > { %985 = vmatprep.subr.bf16.mxu1 %v3907_v6  ;;  %v3915_v12 = vld [vmem:[%s5771_s3 + $0x150] ss:$8 sps:$4 sm:$0xff]   ;;  %v3919_v13 = vld [vmem:[%s5771_s3 + $0x144] ss:$8 sps:$4 sm:$0xff]   ;;  %v3918_v14 = vld [vmem:[%s5771_s3 + $0x40] ss:$8 sps:$4 sm:$0xff]  }
  0x1e   : > { %v3922_v15 = vld [vmem:[%s5771_s3 + $0x34] ss:$8 sps:$4 sm:$0xff]   ;;  %v3921_v16 = vld [vmem:[%s5771_s3 + $0x140] ss:$8 sps:$4 sm:$0xff]   ;;  %v3924_v18 = vld [vmem:[%s5771_s3 + $0x30] ss:$8 sps:$4 sm:$0xff]  }
  0x1f   : > { %933 = vmatpush1.bf16.msra.mxu0 %v3906_v5  ;;  %v3925_v17 = vld [vmem:[%s5771_s3 + $0x134] ss:$8 sps:$4 sm:$0xff]   ;;  %v3928_v19 = vld [vmem:[%s5771_s3 + $0x24] ss:$8 sps:$4 sm:$0xff]   ;;  %v3927_v20 = vld [vmem:[%s5771_s3 + $0x130] ss:$8 sps:$4 sm:$0xff]  }
  0x20   : > { %934 = vmatprep.subr.bf16.mxu0 %v3910_v8  ;;  %986 = vmatpush1.bf16.msra.mxu1 %v3909_v7  ;;  %v3931_v21 = vld [vmem:[%s5771_s3 + $0x124] ss:$8 sps:$4 sm:$0xff]   ;;  %v3930_v22 = vld [vmem:[%s5771_s3 + $0x20] ss:$8 sps:$4 sm:$0xff]   ;;  %v3934_v23 = vld [vmem:[%s5771_s3 + $0x14] ss:$8 sps:$4 sm:$0xff]  }
  0x21   : > { %987 = vmatprep.subr.bf16.mxu1 %v3913_v10  ;;  %v3933_v24 = vld [vmem:[%s5771_s3 + $0x120] ss:$8 sps:$4 sm:$0xff]   ;;  %v3937_v25 = vld [vmem:[%s5771_s3 + $0x114] ss:$8 sps:$4 sm:$0xff]   ;;  %v3936_v26 = vld [vmem:[%s5771_s3 + $0x10] ss:$8 sps:$4 sm:$0xff]  }
  0x22   : > { %v3940_v27 = vld [vmem:[%s5771_s3 + $0x4] ss:$8 sps:$4 sm:$0xff]   ;;  %v3939_v28 = vld [vmem:[%s5771_s3 + $0x110] ss:$8 sps:$4 sm:$0xff]   ;;  %s384_s16 = scalar_select %p383_p12, %s4488_s9, 1  ;;  %vm923_vm0 = vcmask 523264  }
  0x23   : > { %935 = vmatpush1.bf16.msra.mxu0 %v3912_v9  ;;  %v3943_v29 = vld [vmem:[%s5771_s3 + $0x104] ss:$8 sps:$4 sm:$0xff]   ;;  %s5800_s26 = smov (!%p385_p13, %s3393_s26), 7  ;;  %v3942_v30 = vld [vmem:[%s5771_s3] ss:$8 sps:$4 sm:$0xff]  }
  0x24   : > { %936 = vmatprep.subr.bf16.mxu0 %v3916_v11  ;;  %988 = vmatpush1.bf16.msra.mxu1 %v3915_v12  ;;  %v3946_v31 = vld [vmem:[%s5771_s3 + $0xf4] ss:$8 sps:$4 sm:$0xff]   ;;  %v3945_v32 = vld [vmem:[%s5771_s3 + $0x100] ss:$8 sps:$4 sm:$0xff]   ;;  %s3823_s13 = smul.u32 40, %s384_s16  ;;  %s379_s16 = sand.u32 1, %s4476_s28  }
  0x25   : > { %989 = vmatprep.subr.bf16.mxu1 %v3919_v13  ;;  %v3949_v33 = vld [vmem:[%s5771_s3 + $0x1f4] ss:$8 sps:$4 sm:$0xff]   ;;  %s3822_s11 = smul.u32 5, %s5800_s26  ;;  %v3948_v34 = vld [vmem:[%s5771_s3 + $0xf0] ss:$8 sps:$4 sm:$0xff]   ;;  %s3392_s17 = sshll.u32 %s379_s16, 6 }
  0x26   : > { %v3952_v35 = vld [vmem:[%s5771_s3 + $0xe4] ss:$8 sps:$4 sm:$0xff]   ;;  %v3951_v36 = vld [vmem:[%s5771_s3 + $0x1f0] ss:$8 sps:$4 sm:$0xff]   ;;  %v3954_v38 = vld [vmem:[%s5771_s3 + $0xe0] ss:$8 sps:$4 sm:$0xff]  }
  0x27   : > { %937 = vmatpush1.bf16.msra.mxu0 %v3918_v14  ;;  %v3955_v37 = vld [vmem:[%s5771_s3 + $0x1e4] ss:$8 sps:$4 sm:$0xff]   ;;  %s389_s26 = sadd.s32 %s3823_s13, %s3822_s11  ;;  %v3958_v39 = vld [vmem:[%s5771_s3 + $0xd4] ss:$8 sps:$4 sm:$0xff]   ;;  %v3957_v40 = vld [vmem:[%s5771_s3 + $0x1e0] ss:$8 sps:$4 sm:$0xff]  }
  0x28   : > { %938 = vmatprep.subr.bf16.mxu0 %v3922_v15  ;;  %990 = vmatpush1.bf16.msra.mxu1 %v3921_v16  ;;  %s4748_s15 = sshll.u32 %s389_s26, 2  ;;  %v3961_v41 = vld [vmem:[%s5771_s3 + $0x1d4] ss:$8 sps:$4 sm:$0xff]   ;;  %v3960_v42 = vld [vmem:[%s5771_s3 + $0xd0] ss:$8 sps:$4 sm:$0xff]   ;;  %s5688_s20 = scalar_lea.vmem [#allocation2], %s3392_s17 }
  0x29   : > { %991 = vmatprep.subr.bf16.mxu1 %v3925_v17  ;;  %v3964_v43 = vld [vmem:[%s5771_s3 + $0xc4] ss:$8 sps:$4 sm:$0xff]   ;;  %s4763_s26 = scalar_lea.vmem %s5768_s0, %s4748_s15  ;;  %v3963_v44 = vld [vmem:[%s5771_s3 + $0x1d0] ss:$8 sps:$4 sm:$0xff]   ;;  %v3966_v46 = vld [vmem:[%s5771_s3 + $0xc0] ss:$8 sps:$4 sm:$0xff]   ;;  %s4951_s11 = scalar_lea.vmem %s5769_s1, %s4748_s15 }
  0x2a   : > { %v3967_v45 = vld [vmem:[%s5771_s3 + $0x1c4] ss:$8 sps:$4 sm:$0xff]   ;;  %v3970_v48 = vld [vmem:[%s5771_s3 + $0xb4] ss:$8 sps:$4 sm:$0xff]   ;;  %v3969_v49 = vld [vmem:[%s5771_s3 + $0x1c0] ss:$8 sps:$4 sm:$0xff]   ;;  %s5334_s13 = scalar_lea.vmem %s5770_s2, %s4748_s15 }
  0x2b   : > { %939 = vmatpush1.bf16.msra.mxu0 %v3924_v18  ;;  %v3995_v47 = vld [vmem:[%s4763_s26 + $0x4] ss:$20 sps:$4 sm:$0xff]   ;;  %v3973_v50 = vld [vmem:[%s5771_s3 + $0x1b4] ss:$8 sps:$4 sm:$0xff]   ;;  %v4002_v51 = vld [vmem:[%s4763_s26 + $0xc] ss:$20 sps:$4 sm:$0xff]  }
  0x2c   : > { %940 = vmatprep.subr.bf16.mxu0 %v3928_v19  ;;  %992 = vmatpush1.bf16.msra.mxu1 %v3927_v20  ;;  %v3972_v52 = vld [vmem:[%s5771_s3 + $0xb0] ss:$8 sps:$4 sm:$0xff]   ;;  %v3976_v53 = vld [vmem:[%s5771_s3 + $0xa4] ss:$8 sps:$4 sm:$0xff]   ;;  %v3978_v56 = vld [vmem:[%s5771_s3 + $0xa0] ss:$8 sps:$4 sm:$0xff]  }
  0x2d   : > { %993 = vmatprep.subr.bf16.mxu1 %v3931_v21  ;;  %962 = vmatprep.mubr.bf16.mxu0 %v3995_v47  ;;  %v3975_v54 = vld [vmem:[%s5771_s3 + $0x1b0] ss:$8 sps:$4 sm:$0xff]   ;;  %v3979_v55 = vld [vmem:[%s5771_s3 + $0x1a4] ss:$8 sps:$4 sm:$0xff]   ;;  %v3982_v57 = vld [vmem:[%s5771_s3 + $0x94] ss:$8 sps:$4 sm:$0xff]  }
  0x2e   : > { %1015 = vmatprep.mubr.bf16.mxu1 %v4002_v51  ;;  %v3981_v58 = vld [vmem:[%s5771_s3 + $0x1a0] ss:$8 sps:$4 sm:$0xff]   ;;  %v3985_v59 = vld [vmem:[%s5771_s3 + $0x194] ss:$8 sps:$4 sm:$0xff]   ;;  %v3984_v60 = vld [vmem:[%s5771_s3 + $0x90] ss:$8 sps:$4 sm:$0xff]  }
  0x2f   : > { %941 = vmatpush1.bf16.msra.mxu0 %v3930_v22  ;;  %v3988_v61 = vld [vmem:[%s5771_s3 + $0x84] ss:$8 sps:$4 sm:$0xff]   ;;  %v3987_v62 = vld [vmem:[%s5771_s3 + $0x190] ss:$8 sps:$4 sm:$0xff]   ;;  %v3990_v0 = vld [vmem:[%s5771_s3 + $0x80] ss:$8 sps:$4 sm:$0xff]  }
  0x30   : > { %942 = vmatprep.subr.bf16.mxu0 %v3934_v23  ;;  %994 = vmatpush1.bf16.msra.mxu1 %v3933_v24  ;;  %v3991_v63 = vld [vmem:[%s5771_s3 + $0x184] ss:$8 sps:$4 sm:$0xff]   ;;  %v3993_v1 = vld [vmem:[%s4763_s26] ss:$20 sps:$4 sm:$0xff]   ;;  %v3997_v4 = vld [vmem:[%s5771_s3 + $0x230] ss:$8 sps:$4 sm:$0xff]  }
  0x31   : > { %995 = vmatprep.subr.bf16.mxu1 %v3937_v25  ;;  %v3996_v2 = vld [vmem:[%s5771_s3 + $0x180] ss:$8 sps:$4 sm:$0xff]   ;;  %v3999_v3 = vld [vmem:[%s5771_s3 + $0x234] ss:$8 sps:$4 sm:$0xff]   ;;  %v4005_v8 = vld [vmem:[%s5771_s3 + $0x224] ss:$8 sps:$4 sm:$0xff]  }
  0x32   : > { %v4020_v5 = vld [vmem:[%s5772_s4 + $0x74] ss:$8 sps:$4 sm:$0xff]   ;;  %v4006_v6 = vld [vmem:[%s4763_s26 + $0x2c] ss:$20 sps:$4 sm:$0xff]   ;;  %v4018_v10 = vld [vmem:[%s5772_s4 + $0x70] ss:$8 sps:$4 sm:$0xff]  }
  0x33   : > { %943 = vmatpush1.bf16.msra.mxu0 %v3936_v26  ;;  %v4000_v7 = vld [vmem:[%s4763_s26 + $0x8] ss:$20 sps:$4 sm:$0xff]   ;;  %v4027_v11 = vld [vmem:[%s5772_s4 + $0x64] ss:$8 sps:$4 sm:$0xff]   ;;  %v4009_v17 = vld [vmem:[%s5771_s3 + $0x210] ss:$8 sps:$4 sm:$0xff]  }
  0x34   : > { %944 = vmatprep.subr.bf16.mxu0 %v3940_v27  ;;  %996 = vmatpush1.bf16.msra.mxu1 %v3939_v28  ;;  %v4012_v9 = vld [vmem:[%s4763_s26 + $0x34] ss:$20 sps:$4 sm:$0xff]   ;;  %v4014_v18 = vld [vmem:[%s4763_s26 + $0x30] ss:$20 sps:$4 sm:$0xff]   ;;  %v4502_v23 = vmov 0   ;;  %s3260_s9 = sshll.u32 %s5688_s20, 4  ;;  %s5711_s9 = int_to_ptr.vmem [resolvable:$true] %s3260_s9 }
  0x35   : > { %997 = vmatprep.subr.bf16.mxu1 %v3943_v29  ;;  %v4003_v12 = vld [vmem:[%s5771_s3 + $0x220] ss:$8 sps:$4 sm:$0xff]   ;;  %v4011_v13 = vld [vmem:[%s5771_s3 + $0x214] ss:$8 sps:$4 sm:$0xff]   ;;  %v4017_v19 = vld [vmem:[%s5771_s3 + $0x204] ss:$8 sps:$4 sm:$0xff]  }
  0x36   : > { %v4008_v14 = vld [vmem:[%s4763_s26 + $0x28] ss:$20 sps:$4 sm:$0xff]   ;;  %v4031_v20 = vld [vmem:[%s5772_s4 + $0x50] ss:$8 sps:$4 sm:$0xff]   ;;  %v4040_v21 = vld [vmem:[%s5772_s4 + $0x44] ss:$8 sps:$4 sm:$0xff]  }
  0x37   : > { %945 = vmatpush1.bf16.msra.mxu0 %v3942_v30  ;;  %v4025_v15 = vld [vmem:[%s5772_s4 + $0x60] ss:$8 sps:$4 sm:$0xff]   ;;  %v4033_v16 = vld [vmem:[%s5772_s4 + $0x54] ss:$8 sps:$4 sm:$0xff]   ;;  %v4021_v25 = vld [vmem:[%s4763_s26 + $0x10] ss:$20 sps:$4 sm:$0xff]  }
  0x38   : > { %946 = vmatprep.subr.bf16.mxu0 %v3946_v31  ;;  %998 = vmatpush1.bf16.msra.mxu1 %v3945_v32  ;;  %v4015_v22 = vld [vmem:[%s5771_s3 + $0x200] ss:$8 sps:$4 sm:$0xff]   ;;  %v4024_v24 = vld [vmem:[%s5772_s4 + $0x174] ss:$8 sps:$4 sm:$0xff]   ;;  %v4022_v28 = vld [vmem:[%s5772_s4 + $0x170] ss:$8 sps:$4 sm:$0xff]  }
  0x39   : > { %999 = vmatprep.subr.bf16.mxu1 %v3949_v33  ;;  %v4038_v26 = vld [vmem:[%s5772_s4 + $0x40] ss:$8 sps:$4 sm:$0xff]   ;;  %v4046_v27 = vld [vmem:[%s5772_s4 + $0x34] ss:$8 sps:$4 sm:$0xff]   ;;  %v4030_v29 = vld [vmem:[%s5772_s4 + $0x164] ss:$8 sps:$4 sm:$0xff]  }
  0x3a   : > { %v4044_v30 = vld [vmem:[%s5772_s4 + $0x30] ss:$8 sps:$4 sm:$0xff]   ;;  %v4052_v31 = vld [vmem:[%s5772_s4 + $0x24] ss:$8 sps:$4 sm:$0xff]   ;;  %v4028_v32 = vld [vmem:[%s5772_s4 + $0x160] ss:$8 sps:$4 sm:$0xff]  }
  0x3b   : > { %947 = vmatpush2.bf16.msra.mxu0 %v3948_v34  ;;  %v4037_v33 = vld [vmem:[%s5772_s4 + $0x154] ss:$8 sps:$4 sm:$0xff]   ;;  %v4034_v34 = vld [vmem:[%s4763_s26 + $0x38] ss:$20 sps:$4 sm:$0xff]   ;;  %v4053_v47 = vld [vmem:[%s5772_s4 + $0x120] ss:$8 sps:$4 sm:$0xff]  }
  0x3c   : > { %948 = vmatprep.subr.bf16.mxu0 %v3952_v35  ;;  %1000 = vmatpush2.bf16.msra.mxu1 %v3951_v36  ;;  %v4050_v35 = vld [vmem:[%s5772_s4 + $0x20] ss:$8 sps:$4 sm:$0xff]   ;;  %v4058_v36 = vld [vmem:[%s5772_s4 + $0x14] ss:$8 sps:$4 sm:$0xff]   ;;  %s4408_s14 = scalar_lea.vmem %s5711_s9, 1024  ;;  %s4503_s26 = smov [#allocation2]  }
  0x3d   : > { %1001 = vmatprep.subr.bf16.mxu1 %v3955_v37  ;;  %v4035_v37 = vld [vmem:[%s5772_s4 + $0x150] ss:$8 sps:$4 sm:$0xff]   ;;  %v4061_v51 = vld [vmem:[%s5772_s4 + $0x114] ss:$8 sps:$4 sm:$0xff]   ;;  %p4409_p0 = scmp.ne.s32.totalorder %s5711_s9, %s4408_s14  ;;  %s4412_s17 = sshll.u32 %s4503_s26, 4  ;;  %s4413_s17 = int_to_ptr.vmem [resolvable:$false] %s4412_s17 }
  0x3e   : > { %p4415_p4 = scmp.lt.s32.totalorder %s5711_s9, %s4413_s17 }
  0x3f   : > { %949 = vmatpush2.bf16.msra.mxu0 %v3954_v38  ;;  %v4043_v38 = vld [vmem:[%s5772_s4 + $0x144] ss:$8 sps:$4 sm:$0xff]   ;;  %p4410_p1 = pnand %p4409_p0, %p4602_p3 }
  0x40   : > { %950 = vmatprep.subr.bf16.mxu0 %v3958_v39  ;;  %1002 = vmatpush2.bf16.msra.mxu1 %v3957_v40  ;;  %v4056_v39 = vld [vmem:[%s5772_s4 + $0x10] ss:$8 sps:$4 sm:$0xff]   ;;  %v4064_v40 = vld [vmem:[%s5772_s4 + $0x4] ss:$8 sps:$4 sm:$0xff]  }
  0x41   : > { %1003 = vmatprep.subr.bf16.mxu1 %v3961_v41  ;;  %v4041_v41 = vld [vmem:[%s5772_s4 + $0x140] ss:$8 sps:$4 sm:$0xff]   ;;  %p4411_p2 = pneg %p4410_p1 }
  0x43   : > { %951 = vmatpush2.bf16.msra.mxu0 %v3960_v42  ;;  %v4049_v42 = vld [vmem:[%s5772_s4 + $0x134] ss:$8 sps:$4 sm:$0xff]  }
  0x44   : > { %952 = vmatprep.subr.bf16.mxu0 %v3964_v43  ;;  %1004 = vmatpush2.bf16.msra.mxu1 %v3963_v44  ;;  %v4062_v43 = vld [vmem:[%s5772_s4] ss:$8 sps:$4 sm:$0xff]   ;;  %v4070_v44 = vld [vmem:[%s5772_s4 + $0xf4] ss:$8 sps:$4 sm:$0xff]  }
  0x45   : > { %1005 = vmatprep.subr.bf16.mxu1 %v3967_v45  ;;  %v4047_v45 = vld [vmem:[%s5772_s4 + $0x130] ss:$8 sps:$4 sm:$0xff]  }
  0x47   : > { %953 = vmatpush2.bf16.msra.mxu0 %v3966_v46  ;;  %v4055_v46 = vld [vmem:[%s5772_s4 + $0x124] ss:$8 sps:$4 sm:$0xff]  }
  0x48   : > { %954 = vmatprep.subr.bf16.mxu0 %v3970_v48  ;;  %1006 = vmatpush2.bf16.msra.mxu1 %v3969_v49  ;;  %v4068_v48 = vld [vmem:[%s5772_s4 + $0xf0] ss:$8 sps:$4 sm:$0xff]   ;;  %v4076_v49 = vld [vmem:[%s5772_s4 + $0xe4] ss:$8 sps:$4 sm:$0xff]  }
  0x49   : > { %1007 = vmatprep.subr.bf16.mxu1 %v3973_v50  ;;  %v4118_v50 = vld [vmem:[%s4951_s11 + $0x4] ss:$20 sps:$4 sm:$0xff]  }
  0x4b   : > { %955 = vmatpush2.bf16.msra.mxu0 %v3972_v52  ;;  %v4121_v52 = vld [vmem:[%s4951_s11 + $0xc] ss:$20 sps:$4 sm:$0xff]  }
  0x4c   : > { %956 = vmatprep.subr.bf16.mxu0 %v3976_v53  ;;  %1008 = vmatpush2.bf16.msra.mxu1 %v3975_v54  ;;  %v4074_v53 = vld [vmem:[%s5772_s4 + $0xe0] ss:$8 sps:$4 sm:$0xff]   ;;  %v4082_v54 = vld [vmem:[%s5772_s4 + $0xd4] ss:$8 sps:$4 sm:$0xff]  }
  0x4d   : > { %1009 = vmatprep.subr.bf16.mxu1 %v3979_v55  ;;  %v4059_v55 = vld [vmem:[%s5772_s4 + $0x110] ss:$8 sps:$4 sm:$0xff]  }
  0x4f   : > { %957 = vmatpush2.bf16.msra.mxu0 %v3978_v56  ;;  %v4067_v56 = vld [vmem:[%s5772_s4 + $0x104] ss:$8 sps:$4 sm:$0xff]  }
  0x50   : > { %958 = vmatprep.subr.bf16.mxu0 %v3982_v57  ;;  %1010 = vmatpush2.bf16.msra.mxu1 %v3981_v58  ;;  %v4080_v57 = vld [vmem:[%s5772_s4 + $0xd0] ss:$8 sps:$4 sm:$0xff]   ;;  %v4088_v58 = vld [vmem:[%s5772_s4 + $0xc4] ss:$8 sps:$4 sm:$0xff]  }
  0x51   : > { %1011 = vmatprep.subr.bf16.mxu1 %v3985_v59  ;;  %v4065_v59 = vld [vmem:[%s5772_s4 + $0x100] ss:$8 sps:$4 sm:$0xff]  }
  0x53   : > { %959 = vmatpush2.bf16.msra.mxu0 %v3984_v60  ;;  %v4073_v60 = vld [vmem:[%s5772_s4 + $0x1f4] ss:$8 sps:$4 sm:$0xff]  }
  0x54   : > { %960 = vmatprep.subr.bf16.mxu0 %v3988_v61  ;;  %1012 = vmatpush2.bf16.msra.mxu1 %v3987_v62  ;;  %v4086_v61 = vld [vmem:[%s5772_s4 + $0xc0] ss:$8 sps:$4 sm:$0xff]   ;;  %v4094_v62 = vld [vmem:[%s5772_s4 + $0xb4] ss:$8 sps:$4 sm:$0xff]  }
  0x55   : > { %1013 = vmatprep.subr.bf16.mxu1 %v3991_v63  ;;  %v4071_v63 = vld [vmem:[%s5772_s4 + $0x1f0] ss:$8 sps:$4 sm:$0xff]  }
  0x57   : > { %961 = vmatpush2.bf16.msra.mxu0 %v3990_v0  ;;  %v4079_v0 = vld [vmem:[%s5772_s4 + $0x1e4] ss:$8 sps:$4 sm:$0xff]  }
  0x58   : > { %1044 = vmatprep.subr.bf16.mxu0 %v3999_v3  ;;  %1014 = vmatpush2.bf16.msra.mxu1 %v3996_v2  ;;  %v4100_v2 = vld [vmem:[%s5772_s4 + $0xa4] ss:$8 sps:$4 sm:$0xff]   ;;  %v4077_v3 = vld [vmem:[%s5772_s4 + $0x1e0] ss:$8 sps:$4 sm:$0xff]  }
  0x59   : > { %1646 = vmatprep.subr.bf16.mxu1 %v4020_v5  ;;  %v4098_v5 = vld [vmem:[%s5772_s4 + $0xa0] ss:$8 sps:$4 sm:$0xff]  }
  0x5a   : > { %963 = vmatmul.mubr.bf16.vlgmr.msra.gmra.mxu0 %v3993_v1  ;;  %v4092_v1 = vld [vmem:[%s5772_s4 + $0xb0] ss:$8 sps:$4 sm:$0xff]  }
  0x5b   : > { %1045 = vmatpush1.bf16.msra.mxu0 %v3997_v4  ;;  %972 = vmatprep.mubr.bf16.mxu0 %v4006_v6  ;;  %v4085_v4 = vld [vmem:[%s5772_s4 + $0x1d4] ss:$8 sps:$4 sm:$0xff]  }
  0x5c   : > { %1016 = vmatmul.mubr.bf16.vlgmr.msra.gmra.mxu1 %v4000_v7  ;;  %1046 = vmatprep.subr.bf16.mxu0 %v4005_v8  ;;  %v4106_v6 = vld [vmem:[%s5772_s4 + $0x94] ss:$8 sps:$4 sm:$0xff]   ;;  %v4083_v7 = vld [vmem:[%s5772_s4 + $0x1d0] ss:$8 sps:$4 sm:$0xff]   ;;  %v4091_v8 = vld [vmem:[%s5772_s4 + $0x1c4] ss:$8 sps:$4 sm:$0xff]  }
  0x5d   : > { %1025 = vmatprep.mubr.bf16.mxu1 %v4012_v9  ;;  %1647 = vmatpush1.bf16.msra.mxu1 %v4018_v10  ;;  %v4089_v9 = vld [vmem:[%s5772_s4 + $0x1c0] ss:$8 sps:$4 sm:$0xff]   ;;  %v4104_v10 = vld [vmem:[%s5772_s4 + $0x90] ss:$8 sps:$4 sm:$0xff]  }
  0x5e   : > { %1648 = vmatprep.subr.bf16.mxu1 %v4027_v11  ;;  %v4097_v11 = vld [vmem:[%s5772_s4 + $0x1b4] ss:$8 sps:$4 sm:$0xff]  }
  0x5f   : > { %1047 = vmatpush1.bf16.msra.mxu0 %v4003_v12  ;;  %v4112_v12 = vld [vmem:[%s5772_s4 + $0x84] ss:$8 sps:$4 sm:$0xff]  }
  0x60   : > { %1048 = vmatprep.subr.bf16.mxu0 %v4011_v13  ;;  %v4110_v13 = vld [vmem:[%s5772_s4 + $0x80] ss:$8 sps:$4 sm:$0xff]  }
  0x61   : > { %1649 = vmatpush1.bf16.msra.mxu1 %v4025_v15  ;;  %v4095_v15 = vld [vmem:[%s5772_s4 + $0x1b0] ss:$8 sps:$4 sm:$0xff]  }
  0x62   : > { %973 = vmatmul.mubr.bf16.gmra.mxu0 %v4008_v14  ;;  %1650 = vmatprep.subr.bf16.mxu1 %v4033_v16  ;;  %v4144_v14 = vld [vmem:[%s5775_s7 + $0x74] ss:$8 sps:$4 sm:$0xff]   ;;  %v4103_v16 = vld [vmem:[%s5772_s4 + $0x1a4] ss:$8 sps:$4 sm:$0xff]  }
  0x63   : > { %1049 = vmatpush1.bf16.msra.mxu0 %v4009_v17  ;;  %1068 = vmatprep.mubr.bf16.mxu0 %v4502_v23  ;;  %v4116_v17 = vld [vmem:[%s4951_s11] ss:$20 sps:$4 sm:$0xff]  }
  0x64   : > { %1026 = vmatmul.mubr.bf16.gmra.mxu1 %v4014_v18  ;;  %1050 = vmatprep.subr.bf16.mxu0 %v4017_v19  ;;  %v4128_v18 = vld [vmem:[%s4951_s11 + $0x2c] ss:$20 sps:$4 sm:$0xff]   ;;  %v4142_v19 = vld [vmem:[%s5775_s7 + $0x70] ss:$8 sps:$4 sm:$0xff]  }
  0x65   : > { %1651 = vmatpush1.bf16.msra.mxu1 %v4031_v20  ;;  %1678 = vmatprep.mubr.bf16.mxu1 %v4118_v50  ;;  %v4101_v20 = vld [vmem:[%s5772_s4 + $0x1a0] ss:$8 sps:$4 sm:$0xff]   ;;  %v4165_v50 = vld [vmem:[%s5775_s7 + $0x4] ss:$8 sps:$4 sm:$0xff]  }
  0x66   : > { %1652 = vmatprep.subr.bf16.mxu1 %v4040_v21  ;;  %v4109_v21 = vld [vmem:[%s5772_s4 + $0x194] ss:$8 sps:$4 sm:$0xff]  }
  0x67   : > { %1051 = vmatpush1.bf16.msra.mxu0 %v4015_v22  ;;  %v4147_v22 = vld [vmem:[%s5775_s7 + $0x64] ss:$8 sps:$4 sm:$0xff]  }
  0x68   : > { %1699 = vmatprep.subr.bf16.mxu0 %v4024_v24  ;;  %v4145_v24 = vld [vmem:[%s5775_s7 + $0x60] ss:$8 sps:$4 sm:$0xff]  }
  0x69   : > { %1653 = vmatpush1.bf16.msra.mxu1 %v4038_v26  ;;  %v4115_v26 = vld [vmem:[%s5772_s4 + $0x184] ss:$8 sps:$4 sm:$0xff]  }
  0x6a   : > { %3481 = vmatmul.mubr.msk.bf16.vlgmr.msra.gmra.mxu0 %vm923_vm0, %v4021_v25  ;;  %1654 = vmatprep.subr.bf16.mxu1 %v4046_v27  ;;  %v4107_v25 = vld [vmem:[%s5772_s4 + $0x190] ss:$8 sps:$4 sm:$0xff]   ;;  %v4130_v27 = vld [vmem:[%s4951_s11 + $0x28] ss:$20 sps:$4 sm:$0xff]  }
  0x6b   : > { %1700 = vmatpush1.bf16.msra.mxu0 %v4022_v28  ;;  %1078 = vmatprep.mubr.bf16.mxu0 %v4502_v23  ;;  %v4150_v28 = vld [vmem:[%s5775_s7 + $0x54] ss:$8 sps:$4 sm:$0xff]  }
  0x6c   : > { %1701 = vmatprep.subr.bf16.mxu0 %v4030_v29  ;;  %v4148_v29 = vld [vmem:[%s5775_s7 + $0x50] ss:$8 sps:$4 sm:$0xff]  }
  0x6d   : > { %1655 = vmatpush1.bf16.msra.mxu1 %v4044_v30  ;;  %v4113_v30 = vld [vmem:[%s5772_s4 + $0x180] ss:$8 sps:$4 sm:$0xff]  }
  0x6e   : > { %1656 = vmatprep.subr.bf16.mxu1 %v4052_v31  ;;  %v4124_v31 = vld [vmem:[%s5772_s4 + $0x234] ss:$8 sps:$4 sm:$0xff]  }
  0x6f   : > { %1702 = vmatpush1.bf16.msra.mxu0 %v4028_v32  ;;  %v4153_v32 = vld [vmem:[%s5775_s7 + $0x44] ss:$8 sps:$4 sm:$0xff]  }
  0x70   : > { %1703 = vmatprep.subr.bf16.mxu0 %v4037_v33  ;;  %v4151_v33 = vld [vmem:[%s5775_s7 + $0x40] ss:$8 sps:$4 sm:$0xff]  }
  0x71   : > { %1657 = vmatpush1.bf16.msra.mxu1 %v4050_v35  ;;  %v4122_v35 = vld [vmem:[%s5772_s4 + $0x230] ss:$8 sps:$4 sm:$0xff]  }
  0x72   : > { %3482 = vmatmul.mubr.msk.bf16.gmra.mxu0 %vm923_vm0, %v4034_v34  ;;  %1658 = vmatprep.subr.bf16.mxu1 %v4058_v36  ;;  %v4119_v34 = vld [vmem:[%s4951_s11 + $0x8] ss:$20 sps:$4 sm:$0xff]  }
  0x73   : > { %1704 = vmatpush1.bf16.msra.mxu0 %v4035_v37  ;;  %1731 = vmatprep.mubr.bf16.mxu0 %v4121_v52  ;;  %v4131_v36 = vld [vmem:[%s4951_s11 + $0x34] ss:$20 sps:$4 sm:$0xff]   ;;  %v4127_v37 = vld [vmem:[%s5772_s4 + $0x224] ss:$8 sps:$4 sm:$0xff]  }
  0x74   : > { %1705 = vmatprep.subr.bf16.mxu0 %v4043_v38  ;;  %v4156_v38 = vld [vmem:[%s5775_s7 + $0x34] ss:$8 sps:$4 sm:$0xff]   ;;  %v4140_v52 = vld [vmem:[%s4951_s11 + $0x10] ss:$20 sps:$4 sm:$0xff]  }
  0x75   : > { %1659 = vmatpush1.bf16.msra.mxu1 %v4056_v39  ;;  %v4154_v39 = vld [vmem:[%s5775_s7 + $0x30] ss:$8 sps:$4 sm:$0xff]  }
  0x76   : > { %1660 = vmatprep.subr.bf16.mxu1 %v4064_v40  ;;  %v4125_v40 = vld [vmem:[%s5772_s4 + $0x220] ss:$8 sps:$4 sm:$0xff]  }
  0x77   : > { %1706 = vmatpush1.bf16.msra.mxu0 %v4041_v41  ;;  %v4136_v41 = vld [vmem:[%s5772_s4 + $0x214] ss:$8 sps:$4 sm:$0xff]  }
  0x78   : > { %1707 = vmatprep.subr.bf16.mxu0 %v4049_v42  ;;  %v4159_v42 = vld [vmem:[%s5775_s7 + $0x24] ss:$8 sps:$4 sm:$0xff]  }
  0x79   : > { %1661 = vmatpush1.bf16.msra.mxu1 %v4062_v43  ;;  %v4157_v43 = vld [vmem:[%s5775_s7 + $0x20] ss:$8 sps:$4 sm:$0xff]  }
  0x7a   : > { %1662 = vmatprep.subr.bf16.mxu1 %v4070_v44  ;;  %v4133_v44 = vld [vmem:[%s4951_s11 + $0x30] ss:$20 sps:$4 sm:$0xff]  }
  0x7b   : > { %1708 = vmatpush1.bf16.msra.mxu0 %v4047_v45  ;;  %v4134_v45 = vld [vmem:[%s5772_s4 + $0x210] ss:$8 sps:$4 sm:$0xff]  }
  0x7c   : > { %1709 = vmatprep.subr.bf16.mxu0 %v4055_v46  ;;  %v4139_v46 = vld [vmem:[%s5772_s4 + $0x204] ss:$8 sps:$4 sm:$0xff]  }
  0x7d   : > { %1663 = vmatpush2.bf16.msra.mxu1 %v4068_v48  ;;  %v4160_v48 = vld [vmem:[%s5775_s7 + $0x10] ss:$8 sps:$4 sm:$0xff]  }
  0x7e   : > { %1664 = vmatprep.subr.bf16.mxu1 %v4076_v49  ;;  %v4137_v49 = vld [vmem:[%s5772_s4 + $0x200] ss:$8 sps:$4 sm:$0xff]  }
  0x7f   : > { %1710 = vmatpush1.bf16.msra.mxu0 %v4053_v47  ;;  %v4162_v47 = vld [vmem:[%s5775_s7 + $0x14] ss:$8 sps:$4 sm:$0xff]  }
  0x80   : > { %1711 = vmatprep.subr.bf16.mxu0 %v4061_v51  ;;  %v4163_v51 = vld [vmem:[%s5775_s7] ss:$8 sps:$4 sm:$0xff]  }
  0x81   : > { %1665 = vmatpush2.bf16.msra.mxu1 %v4074_v53  ;;  %v4168_v53 = vld [vmem:[%s5775_s7 + $0xf4] ss:$8 sps:$4 sm:$0xff]  }
  0x82   : > { %1666 = vmatprep.subr.bf16.mxu1 %v4082_v54  ;;  %v4166_v54 = vld [vmem:[%s5775_s7 + $0xf0] ss:$8 sps:$4 sm:$0xff]  }
  0x83   : > { %1712 = vmatpush1.bf16.msra.mxu0 %v4059_v55  ;;  %v4171_v55 = vld [vmem:[%s5775_s7 + $0xe4] ss:$8 sps:$4 sm:$0xff]  }
  0x84   : > { %1713 = vmatprep.subr.bf16.mxu0 %v4067_v56  ;;  %v4169_v56 = vld [vmem:[%s5775_s7 + $0xe0] ss:$8 sps:$4 sm:$0xff]  }
  0x85   : > { %1667 = vmatpush2.bf16.msra.mxu1 %v4080_v57  ;;  %v4141_v57 = vld [vmem:[%s4951_s11 + $0x38] ss:$20 sps:$4 sm:$0xff]   ;;  %s3821_s11 = sshll.u32 %s4484_s30, 3 }
  0x86   : > { %1668 = vmatprep.subr.bf16.mxu1 %v4088_v58  ;;  %v4174_v58 = vld [vmem:[%s5775_s7 + $0xd4] ss:$8 sps:$4 sm:$0xff]   ;;  %s3257_s15 = sadd.s32 %s3821_s11, %s3817_s21  ;;  %s4414_s11 = scalar_lea.vmem %s4413_s17, 2048 }
  0x87   : > { %1714 = vmatpush1.bf16.msra.mxu0 %v4065_v59  ;;  %v4190_v59 = vld [vmem:[%s5775_s7 + $0x170] ss:$8 sps:$4 sm:$0xff]   ;;  %s3818_s30 = sshll.u32 %s3257_s15, 7  ;;  %p4416_p5 = scmp.lt.s32.totalorder %s4414_s11, %s4408_s14 }
  0x88   : > { %1715 = vmatprep.subr.bf16.mxu0 %v4073_v60  ;;  %v4192_v60 = vld [vmem:[%s5775_s7 + $0x174] ss:$8 sps:$4 sm:$0xff]   ;;  %s5709_s25 = scalar_lea.hbm %s5776_s8, %s3818_s30 }
  0x89   : > { %1669 = vmatpush2.bf16.msra.mxu1 %v4086_v61  ;;  %v4172_v61 = vld [vmem:[%s5775_s7 + $0xd0] ss:$8 sps:$4 sm:$0xff]   ;;  %p4417_p6 = por %p4416_p5, %p4415_p4 }
  0x8a   : > { %1670 = vmatprep.subr.bf16.mxu1 %v4094_v62  ;;  %v4195_v62 = vld [vmem:[%s5775_s7 + $0x164] ss:$8 sps:$4 sm:$0xff]  }
  0x8b   : > { %1716 = vmatpush2.bf16.msra.mxu0 %v4071_v63  ;;  %v4177_v63 = vld [vmem:[%s5775_s7 + $0xc4] ss:$8 sps:$4 sm:$0xff]   ;;  %p4418_p7 = pnand %p4417_p6, %p4411_p2 }
  0x8c   : > { %1717 = vmatprep.subr.bf16.mxu0 %v4079_v0  ;;  %v4193_v0 = vld [vmem:[%s5775_s7 + $0x160] ss:$8 sps:$4 sm:$0xff]  }
  0x8d   : > { %1671 = vmatpush2.bf16.msra.mxu1 %v4092_v1  ;;  %v4175_v1 = vld [vmem:[%s5775_s7 + $0xc0] ss:$8 sps:$4 sm:$0xff]  }
  0x8e   : > { %1672 = vmatprep.subr.bf16.mxu1 %v4100_v2  ;;  %v4180_v2 = vld [vmem:[%s5775_s7 + $0xb4] ss:$8 sps:$4 sm:$0xff]  }
  0x8f   : > { %1718 = vmatpush2.bf16.msra.mxu0 %v4077_v3  ;;  %v4198_v3 = vld [vmem:[%s5775_s7 + $0x154] ss:$8 sps:$4 sm:$0xff]  }
  0x90   : > { %1719 = vmatprep.subr.bf16.mxu0 %v4085_v4  ;;  %v4196_v4 = vld [vmem:[%s5775_s7 + $0x150] ss:$8 sps:$4 sm:$0xff]  }
  0x91   : > { %1673 = vmatpush2.bf16.msra.mxu1 %v4098_v5  ;;  %v4178_v5 = vld [vmem:[%s5775_s7 + $0xb0] ss:$8 sps:$4 sm:$0xff]  }
  0x92   : > { %1674 = vmatprep.subr.bf16.mxu1 %v4106_v6  ;;  %v4201_v6 = vld [vmem:[%s5775_s7 + $0x144] ss:$8 sps:$4 sm:$0xff]  }
  0x93   : > { %1720 = vmatpush2.bf16.msra.mxu0 %v4083_v7  ;;  %v4183_v7 = vld [vmem:[%s5775_s7 + $0xa4] ss:$8 sps:$4 sm:$0xff]  }
  0x94   : > { %1721 = vmatprep.subr.bf16.mxu0 %v4091_v8  ;;  %v4199_v8 = vld [vmem:[%s5775_s7 + $0x140] ss:$8 sps:$4 sm:$0xff]  }
  0x95   : > { %1675 = vmatpush2.bf16.msra.mxu1 %v4104_v10  ;;  %v4204_v10 = vld [vmem:[%s5775_s7 + $0x134] ss:$8 sps:$4 sm:$0xff]  }
  0x96   : > { %1676 = vmatprep.subr.bf16.mxu1 %v4112_v12  ;;  %v4202_v12 = vld [vmem:[%s5775_s7 + $0x130] ss:$8 sps:$4 sm:$0xff]  }
  0x97   : > { %1722 = vmatpush2.bf16.msra.mxu0 %v4089_v9  ;;  %v4181_v9 = vld [vmem:[%s5775_s7 + $0xa0] ss:$8 sps:$4 sm:$0xff]  }
  0x98   : > { %1723 = vmatprep.subr.bf16.mxu0 %v4097_v11  ;;  %v4186_v11 = vld [vmem:[%s5775_s7 + $0x94] ss:$8 sps:$4 sm:$0xff]  }
  0x99   : > { %1677 = vmatpush2.bf16.msra.mxu1 %v4110_v13  ;;  %v4184_v13 = vld [vmem:[%s5775_s7 + $0x90] ss:$8 sps:$4 sm:$0xff]  }
  0x9a   : > { %2223 = vmatprep.subr.bf16.mxu1 %v4144_v14  ;;  %v4207_v14 = vld [vmem:[%s5775_s7 + $0x124] ss:$8 sps:$4 sm:$0xff]  }
  0x9b   : > { %1724 = vmatpush2.bf16.msra.mxu0 %v4095_v15  ;;  %v4189_v15 = vld [vmem:[%s5775_s7 + $0x84] ss:$8 sps:$4 sm:$0xff]  }
  0x9c   : > { %1725 = vmatprep.subr.bf16.mxu0 %v4103_v16  ;;  %1679 = vmatmul.mubr.bf16.vlgmr.msra.gmra.mxu1 %v4116_v17  ;;  %v4205_v16 = vld [vmem:[%s5775_s7 + $0x120] ss:$8 sps:$4 sm:$0xff]  }
  0x9d   : > { %1688 = vmatprep.mubr.bf16.mxu1 %v4128_v18  ;;  %2224 = vmatpush1.bf16.msra.mxu1 %v4142_v19  ;;  %v4187_v17 = vld [vmem:[%s5775_s7 + $0x80] ss:$8 sps:$4 sm:$0xff]   ;;  %v4210_v18 = vld [vmem:[%s5775_s7 + $0x114] ss:$8 sps:$4 sm:$0xff]   ;;  %v4208_v19 = vld [vmem:[%s5775_s7 + $0x110] ss:$8 sps:$4 sm:$0xff]  }
  0x9e   : > { %2225 = vmatprep.subr.bf16.mxu1 %v4147_v22  ;;  %v4216_v22 = vld [vmem:[%s5775_s7 + $0x1f4] ss:$8 sps:$4 sm:$0xff]  }
  0x9f   : > { %1726 = vmatpush2.bf16.msra.mxu0 %v4101_v20  ;;  %v4213_v20 = vld [vmem:[%s5775_s7 + $0x104] ss:$8 sps:$4 sm:$0xff]  }
  0xa0   : > { %1727 = vmatprep.subr.bf16.mxu0 %v4109_v21  ;;  %v4211_v21 = vld [vmem:[%s5775_s7 + $0x100] ss:$8 sps:$4 sm:$0xff]  }
  0xa1   : > { %2226 = vmatpush1.bf16.msra.mxu1 %v4145_v24  ;;  %v4214_v24 = vld [vmem:[%s5775_s7 + $0x1f0] ss:$8 sps:$4 sm:$0xff]  }
  0xa2   : > { %2227 = vmatprep.subr.bf16.mxu1 %v4150_v28  ;;  %v4220_v28 = vld [vmem:[%s5775_s7 + $0x1d0] ss:$8 sps:$4 sm:$0xff]  }
  0xa3   : > { %1728 = vmatpush2.bf16.msra.mxu0 %v4107_v25  ;;  %v4219_v25 = vld [vmem:[%s5775_s7 + $0x1e4] ss:$8 sps:$4 sm:$0xff]  }
  0xa4   : > { %1729 = vmatprep.subr.bf16.mxu0 %v4115_v26  ;;  %1689 = vmatmul.mubr.bf16.gmra.mxu1 %v4130_v27  ;;  %v4217_v26 = vld [vmem:[%s5775_s7 + $0x1e0] ss:$8 sps:$4 sm:$0xff]   ;;  %v4222_v27 = vld [vmem:[%s5775_s7 + $0x1d4] ss:$8 sps:$4 sm:$0xff]  }
  0xa5   : > { %2228 = vmatpush1.bf16.msra.mxu1 %v4148_v29  ;;  %v4225_v29 = vld [vmem:[%s5775_s7 + $0x1c4] ss:$8 sps:$4 sm:$0xff]  }
  0xa6   : > { %2229 = vmatprep.subr.bf16.mxu1 %v4153_v32  ;;  %v4226_v32 = vld [vmem:[%s5775_s7 + $0x1b0] ss:$8 sps:$4 sm:$0xff]  }
  0xa7   : > { %1730 = vmatpush2.bf16.msra.mxu0 %v4113_v30  ;;  %v4223_v30 = vld [vmem:[%s5775_s7 + $0x1c0] ss:$8 sps:$4 sm:$0xff]  }
  0xa8   : > { %1760 = vmatprep.subr.bf16.mxu0 %v4124_v31  ;;  %v4228_v31 = vld [vmem:[%s5775_s7 + $0x1b4] ss:$8 sps:$4 sm:$0xff]  }
  0xa9   : > { %2230 = vmatpush1.bf16.msra.mxu1 %v4151_v33  ;;  %v4231_v33 = vld [vmem:[%s5775_s7 + $0x1a4] ss:$8 sps:$4 sm:$0xff]  }
  0xaa   : > { %1732 = vmatmul.mubr.bf16.vlgmr.msra.gmra.mxu0 %v4119_v34  ;;  %2231 = vmatprep.subr.bf16.mxu1 %v4156_v38  ;;  %v4229_v34 = vld [vmem:[%s5775_s7 + $0x1a0] ss:$8 sps:$4 sm:$0xff]  }
  0xab   : > { %1761 = vmatpush1.bf16.msra.mxu0 %v4122_v35  ;;  %1741 = vmatprep.mubr.bf16.mxu0 %v4131_v36  ;;  %v4234_v35 = vld [vmem:[%s5775_s7 + $0x194] ss:$8 sps:$4 sm:$0xff]   ;;  %v4232_v36 = vld [vmem:[%s5775_s7 + $0x190] ss:$8 sps:$4 sm:$0xff]   ;;  %v4235_v38 = vld [vmem:[%s5775_s7 + $0x180] ss:$8 sps:$4 sm:$0xff]  }
  0xac   : > { %1762 = vmatprep.subr.bf16.mxu0 %v4127_v37  ;;  %v4237_v37 = vld [vmem:[%s5775_s7 + $0x184] ss:$8 sps:$4 sm:$0xff]  }
  0xad   : > { %2232 = vmatpush1.bf16.msra.mxu1 %v4154_v39  ;;  %v4240_v39 = vld [vmem:[%s5773_s5 + $0x74] ss:$8 sps:$4 sm:$0xff]  }
  0xae   : > { %2233 = vmatprep.subr.bf16.mxu1 %v4159_v42 }
  0xaf   : > { %1763 = vmatpush1.bf16.msra.mxu0 %v4125_v40  ;;  %v4243_v40 = vld [vmem:[%s5773_s5 + $0x174] ss:$8 sps:$4 sm:$0xff]  }
  0xb0   : > { %1764 = vmatprep.subr.bf16.mxu0 %v4136_v41  ;;  %v503_v41 = vlaneseq }
  0xb1   : > { %2234 = vmatpush1.bf16.msra.mxu1 %v4157_v43 }
  0xb2   : > { %1742 = vmatmul.mubr.bf16.gmra.mxu0 %v4133_v44  ;;  %2235 = vmatprep.subr.bf16.mxu1 %v4162_v47 }
  0xb3   : > { %1765 = vmatpush1.bf16.msra.mxu0 %v4134_v45  ;;  %1784 = vmatprep.mubr.bf16.mxu0 %v4502_v23  ;;  %v504_v45 = vshrl.u32 %v503_v41, 7  ;;  %v4247_v41 = vld [vmem:[%s5773_s5 + $0x160] ss:$8 sps:$4 sm:$0xff]  }
  0xb4   : > { %1766 = vmatprep.subr.bf16.mxu0 %v4139_v46 }
  0xb5   : > { %2236 = vmatpush1.bf16.msra.mxu1 %v4160_v48 }
  0xb6   : > { %2237 = vmatprep.subr.bf16.mxu1 %v4165_v50  ;;  %v5297_v50 = vsub.s32 1, %v504_v45 }
  0xb7   : > { %1767 = vmatpush1.bf16.msra.mxu0 %v4137_v49 }
  0xb8   : > { %2010 = vmatprep.subr.bf16.mxu0 %v4192_v60 }
  0xb9   : > { %2238 = vmatpush1.bf16.msra.mxu1 %v4163_v51  ;;  %v501_v51 = vld [vmem:[%s5774_s6] ss:$4 sm:$0x3] }
  0xba   : > { %3566 = vmatmul.mubr.msk.bf16.vlgmr.msra.gmra.mxu0 %vm923_vm0, %v4140_v52  ;;  %2239 = vmatprep.subr.bf16.mxu1 %v4168_v53  ;;  %v5302_v52 = vsub.s32 0, %v504_v45 }
  0xbb   : > { %1794 = vmatprep.mubr.bf16.mxu0 %v4502_v23  ;;  %2011 = vmatpush1.bf16.msra.mxu0 %v4190_v59 }
  0xbc   : > { %2012 = vmatprep.subr.bf16.mxu0 %v4195_v62 }
  0xbd   : > { %2240 = vmatpush2.bf16.msra.mxu1 %v4166_v54 }
  0xbe   : > { %2241 = vmatprep.subr.bf16.mxu1 %v4171_v55 }
  0xbf   : > { %2013 = vmatpush1.bf16.msra.mxu0 %v4193_v0 }
  0xc0   : > { %2014 = vmatprep.subr.bf16.mxu0 %v4198_v3 }
  0xc1   : > { %2242 = vmatpush2.bf16.msra.mxu1 %v4169_v56  ;;  %v510_v56 = vrot.slane %v501_v51, %v5297_v50 }
  0xc2   : > { %3567 = vmatmul.mubr.msk.bf16.gmra.mxu0 %vm923_vm0, %v4141_v57  ;;  %2243 = vmatprep.subr.bf16.mxu1 %v4174_v58  ;;  %v506_v57 = vrot.slane %v501_v51, %v5302_v52  ;;  %v4261_v51 = vld [vmem:[%s5773_s5 + $0x144] ss:$8 sps:$4 sm:$0xff]  }
  0xc3   : > { %2015 = vmatpush1.bf16.msra.mxu0 %v4196_v4 }
  0xc4   : > { %2016 = vmatprep.subr.bf16.mxu0 %v4201_v6 }
  0xc5   : > { %2244 = vmatpush2.bf16.msra.mxu1 %v4172_v61 }
  0xc6   : > { %2245 = vmatprep.subr.bf16.mxu1 %v4177_v63 }
  0xc7   : > { %2017 = vmatpush1.bf16.msra.mxu0 %v4199_v8 }
  0xc8   : > { %2018 = vmatprep.subr.bf16.mxu0 %v4204_v10 }
  0xc9   : > { %2246 = vmatpush2.bf16.msra.mxu1 %v4175_v1 }
  0xca   : > { %2247 = vmatprep.subr.bf16.mxu1 %v4180_v2 }
  0xcb   : > { %2019 = vmatpush1.bf16.msra.mxu0 %v4202_v12 }
  0xcc   : > { %2020 = vmatprep.subr.bf16.mxu0 %v4207_v14 }
  0xcd   : > { %2248 = vmatpush2.bf16.msra.mxu1 %v4178_v5 }
  0xce   : > { %2249 = vmatprep.subr.bf16.mxu1 %v4183_v7 }
  0xcf   : > { %2021 = vmatpush1.bf16.msra.mxu0 %v4205_v16 }
  0xd0   : > { %2022 = vmatprep.subr.bf16.mxu0 %v4210_v18 }
  0xd1   : > { %2250 = vmatpush2.bf16.msra.mxu1 %v4181_v9 }
  0xd2   : > { %2251 = vmatprep.subr.bf16.mxu1 %v4186_v11 }
  0xd3   : > { %2023 = vmatpush1.bf16.msra.mxu0 %v4208_v19 }
  0xd4   : > { %2024 = vmatprep.subr.bf16.mxu0 %v4213_v20 }
  0xd5   : > { %2252 = vmatpush2.bf16.msra.mxu1 %v4184_v13 }
  0xd6   : > { %2253 = vmatprep.subr.bf16.mxu1 %v4189_v15 }
  0xd7   : > { %2025 = vmatpush1.bf16.msra.mxu0 %v4211_v21 }
  0xd8   : > { %2026 = vmatprep.subr.bf16.mxu0 %v4216_v22 }
  0xd9   : > { %2254 = vmatpush2.bf16.msra.mxu1 %v4187_v17 }
  0xda   : > { %2842 = vmatprep.subr.bf16.mxu1 %v4243_v40 }
  0xdb   : > { %2027 = vmatpush2.bf16.msra.mxu0 %v4214_v24 }
  0xdc   : > { %2028 = vmatprep.subr.bf16.mxu0 %v4219_v25 }
  0xdf   : > { %2029 = vmatpush2.bf16.msra.mxu0 %v4217_v26 }
  0xe0   : > { %2030 = vmatprep.subr.bf16.mxu0 %v4222_v27 }
  0xe3   : > { %2031 = vmatpush2.bf16.msra.mxu0 %v4220_v28 }
  0xe4   : > { %2032 = vmatprep.subr.bf16.mxu0 %v4225_v29 }
  0xe7   : > { %2033 = vmatpush2.bf16.msra.mxu0 %v4223_v30  ;;  %v4241_v30 = vld [vmem:[%s5773_s5 + $0x170] ss:$8 sps:$4 sm:$0xff]  }
  0xe8   : > { %2034 = vmatprep.subr.bf16.mxu0 %v4228_v31 }
  0xeb   : > { %2035 = vmatpush2.bf16.msra.mxu0 %v4226_v32 }
  0xec   : > { %2036 = vmatprep.subr.bf16.mxu0 %v4231_v33 }
  0xef   : > { %2037 = vmatpush2.bf16.msra.mxu0 %v4229_v34  ;;  %v4249_v34 = vld [vmem:[%s5773_s5 + $0x164] ss:$8 sps:$4 sm:$0xff]  }
  0xf0   : > { %2038 = vmatprep.subr.bf16.mxu0 %v4234_v35 }
  0xf3   : > { %2039 = vmatpush2.bf16.msra.mxu0 %v4232_v36 }
  0xf4   : > { %2040 = vmatprep.subr.bf16.mxu0 %v4237_v37 }
  0xf7   : > { %2041 = vmatpush2.bf16.msra.mxu0 %v4235_v38 }
  0xf8   : > { %2789 = vmatprep.subr.bf16.mxu0 %v4240_v39 }
 0x11a   : > { %v964_v42 = vpop.f32.mrf.mxu0 }
 0x11b   : > { %v965_v63 = vadd.f32 %v964_v42, %v506_v57 }
 0x11c   : > { %v966_v43 = vpop.f32.mrf.mxu0  ;;  %v1017_v44 = vpop.f32.mrf.mxu1 }
 0x11d   : > { %v967_v61 = vadd.f32 %v966_v43, %v510_v56  ;;  %v1018_v6 = vadd.f32 %v1017_v44, %v965_v63  ;;  %v4255_v43 = vld [vmem:[%s5773_s5 + $0x154] ss:$8 sps:$4 sm:$0xff]  }
 0x11e   : > { %v968_v46 = vpop.f32.mrf.mxu0  ;;  %v1019_v47 = vpop.f32.mrf.mxu1  ;;  %v4291_v63 = vld [vmem:[%s5773_s5 + $0x1f4] ss:$8 sps:$4 sm:$0xff]  }
 0x11f   : > { %v969_v62 = vadd.f32 %v968_v46, %v506_v57  ;;  %v1020_v4 = vadd.f32 %v1019_v47, %v967_v61  ;;  %v4285_v61 = vld [vmem:[%s5773_s5 + $0x104] ss:$8 sps:$4 sm:$0xff]  }
 0x120   : > { %v970_v48 = vpop.f32.mrf.mxu0  ;;  %v1021_v49 = vpop.f32.mrf.mxu1 }
 0x121   : > { %v971_v1 = vadd.f32 %v970_v48, %v510_v56  ;;  %v1022_v5 = vadd.f32 %v1021_v49, %v969_v62  ;;  %v4253_v48 = vld [vmem:[%s5773_s5 + $0x150] ss:$8 sps:$4 sm:$0xff]   ;;  %v4283_v62 = vld [vmem:[%s5773_s5 + $0x100] ss:$8 sps:$4 sm:$0xff]  }
 0x122   : > { %v974_v53 = vpop.f32.mrf.mxu0  ;;  %v1023_v54 = vpop.f32.mrf.mxu1 }
 0x123   : > { %v1024_v8 = vadd.f32 %v1023_v54, %v971_v1  ;;  %v975_v17 = vadd.f32 %v974_v53, %v506_v57  ;;  %v4259_v53 = vld [vmem:[%s5773_s5 + $0x140] ss:$8 sps:$4 sm:$0xff]   ;;  %v4267_v54 = vld [vmem:[%s5773_s5 + $0x134] ss:$8 sps:$4 sm:$0xff]   ;;  %v4297_v1 = vld [vmem:[%s5773_s5 + $0x1e4] ss:$8 sps:$4 sm:$0xff]  }
 0x124   : > { %v976_v55 = vpop.f32.mrf.mxu0  ;;  %v1027_v59 = vpop.f32.mrf.mxu1 }
 0x125   : > { %v977_v14 = vadd.f32 %v976_v55, %v510_v56  ;;  %v1028_v31 = vadd.f32 %v1027_v59, %v975_v17  ;;  %v4265_v55 = vld [vmem:[%s5773_s5 + $0x130] ss:$8 sps:$4 sm:$0xff]   ;;  %v4279_v59 = vld [vmem:[%s5773_s5 + $0x114] ss:$8 sps:$4 sm:$0xff]  }
 0x126   : > { %v978_v58 = vpop.f32.mrf.mxu0  ;;  %v1029_v2 = vpop.f32.mrf.mxu1  ;;  %v4325_v17 = vld [vmem:[%s5773_s5 + $0x190] ss:$8 sps:$4 sm:$0xff]  }
 0x127   : > { %v979_v15 = vadd.f32 %v978_v58, %v506_v57  ;;  %v1030_v27 = vadd.f32 %v1029_v2, %v977_v14  ;;  %v4342_v57 = vld [vmem:[%s5334_s13 + $0xc] ss:$20 sps:$4 sm:$0xff]   ;;  %v4327_v14 = vld [vmem:[%s5773_s5 + $0x194] ss:$8 sps:$4 sm:$0xff]  }
 0x128   : > { %v980_v60 = vpop.f32.mrf.mxu0  ;;  %v1031_v11 = vpop.f32.mrf.mxu1  ;;  %v4271_v58 = vld [vmem:[%s5773_s5 + $0x120] ss:$8 sps:$4 sm:$0xff]  }
 0x129   : > { %v981_v20 = vadd.f32 %v980_v60, %v510_v56  ;;  %v1032_v28 = vadd.f32 %v1031_v11, %v979_v15  ;;  %v4273_v56 = vld [vmem:[%s5773_s5 + $0x124] ss:$8 sps:$4 sm:$0xff]   ;;  %v4277_v60 = vld [vmem:[%s5773_s5 + $0x110] ss:$8 sps:$4 sm:$0xff]   ;;  %v4295_v2 = vld [vmem:[%s5773_s5 + $0x1e0] ss:$8 sps:$4 sm:$0xff]  }
 0x12a   : > { %v1070_v0 = vpop.f32.mrf.mxu0  ;;  %v1033_v24 = vpop.f32.mrf.mxu1 }
 0x12b   : > { %v1071_v12 = vadd.f32 %v1070_v0, %v1018_v6  ;;  %v1034_v35 = vadd.f32 %v1033_v24, %v981_v20  ;;  %v4289_v0 = vld [vmem:[%s5773_s5 + $0x1f0] ss:$8 sps:$4 sm:$0xff]   ;;  %v4307_v6 = vld [vmem:[%s5773_s5 + $0x1c0] ss:$8 sps:$4 sm:$0xff]  }
 0x12c   : > { %v1072_v3 = vpop.f32.mrf.mxu0 }
 0x12d   : > { %v1073_v9 = vadd.f32 %v1072_v3, %v1020_v4  ;;  %v1089_v25 = vmax.f32 %v1071_v12, 0.0  ;;  %v4303_v3 = vld [vmem:[%s5773_s5 + $0x1d4] ss:$8 sps:$4 sm:$0xff]   ;;  %v4301_v4 = vld [vmem:[%s5773_s5 + $0x1d0] ss:$8 sps:$4 sm:$0xff]  }
 0x12e   : > { %v1074_v7 = vpop.f32.mrf.mxu0  ;;  %v4319_v12 = vld [vmem:[%s5773_s5 + $0x1a0] ss:$8 sps:$4 sm:$0xff]  }
 0x12f   : > { %v1075_v10 = vadd.f32 %v1074_v7, %v1022_v5  ;;  %v1090_v21 = vmax.f32 %v1073_v9, 0.0  ;;  %v4309_v5 = vld [vmem:[%s5773_s5 + $0x1c4] ss:$8 sps:$4 sm:$0xff]   ;;  %v4315_v7 = vld [vmem:[%s5773_s5 + $0x1b4] ss:$8 sps:$4 sm:$0xff]  }
 0x130   : > { %v1076_v13 = vpop.f32.mrf.mxu0  ;;  %v4313_v9 = vld [vmem:[%s5773_s5 + $0x1b0] ss:$8 sps:$4 sm:$0xff]  }
 0x131   : > { %v1077_v16 = vadd.f32 %v1076_v13, %v1024_v8  ;;  %v1091_v18 = vmax.f32 %v1075_v10, 0.0  ;;  %v4321_v10 = vld [vmem:[%s5773_s5 + $0x1a4] ss:$8 sps:$4 sm:$0xff]  }
 0x132   : > { %v1080_v19 = vpop.f32.mrf.mxu0 }
 0x133   : > { %v1092_v22 = vmax.f32 %v1077_v16, 0.0  ;;  %v1097_v32 = vpack.c.bf16 %v1091_v18, %v1089_v25  ;;  %v1081_v38 = vadd.f32 %v1080_v19, %v1028_v31  ;;  %v4333_v19 = vld [vmem:[%s5773_s5 + $0x184] ss:$8 sps:$4 sm:$0xff]  }
 0x134   : > { %v1082_v26 = vpop.f32.mrf.mxu0  ;;  %v3483_v25 = vld [vmem:[%s5774_s6 + $0x1] ss:$4 sm:$0x3] }
 0x135   : > { %v1098_v29 = vpack.c.bf16 %v1092_v22, %v1090_v21  ;;  %v1083_v36 = vadd.f32 %v1082_v26, %v1030_v27  ;;  %v1093_v46 = vmax.f32 %v1081_v38, 0.0  ;;  %v4331_v22 = vld [vmem:[%s5773_s5 + $0x180] ss:$8 sps:$4 sm:$0xff]   ;;  %v1223_v31 = vrot.slane %v3483_v25, %v5302_v52 }
 0x136   : > { %v1084_v33 = vpop.f32.mrf.mxu0 }
 0x137   : > { %v1085_v37 = vadd.f32 %v1084_v33, %v1032_v28  ;;  %2255 = vmatprep.mubr.bf16.mxu1 %v1098_v29  ;;  %v1094_v44 = vmax.f32 %v1083_v36, 0.0  ;;  %v4340_v28 = vld [vmem:[%s5334_s13 + $0x8] ss:$20 sps:$4 sm:$0xff]   ;;  %v1227_v29 = vrot.slane %v3483_v25, %v5297_v50  ;;  %v4336_v25 = vld [vmem:[%s5334_s13 + $0x4] ss:$20 sps:$4 sm:$0xff]  }
 0x138   : > { %v1086_v39 = vpop.f32.mrf.mxu0  ;;  %2256 = vmatmul.mubr.bf16.vlgmr.msra.gmra.mxu1 %v1097_v32 }
 0x139   : > { %v1087_v40 = vadd.f32 %v1086_v39, %v1034_v35  ;;  %2843 = vmatpush1.bf16.msra.mxu1 %v4241_v30  ;;  %v1095_v42 = vmax.f32 %v1085_v37, 0.0  ;;  %v4352_v30 = vld [vmem:[%s5334_s13 + $0x34] ss:$20 sps:$4 sm:$0xff]  }
 0x13a   : > { %2844 = vmatprep.subr.bf16.mxu1 %v4249_v34 }
 0x13b   : > { %v1096_v45 = vmax.f32 %v1087_v40, 0.0  ;;  %v1099_v49 = vpack.c.bf16 %v1095_v42, %v1093_v46  ;;  %v4354_v42 = vld [vmem:[%s5334_s13 + $0x30] ss:$20 sps:$4 sm:$0xff]  }
 0x13d   : > { %v1100_v47 = vpack.c.bf16 %v1096_v45, %v1094_v44  ;;  %2845 = vmatpush1.bf16.msra.mxu1 %v4247_v41 }
 0x13e   : > { %2846 = vmatprep.subr.bf16.mxu1 %v4255_v43 }
 0x13f   : > { %2265 = vmatprep.mubr.bf16.mxu1 %v1100_v47 }
 0x140   : > { %2266 = vmatmul.mubr.bf16.gmra.mxu1 %v1099_v49 }
 0x141   : > { %2847 = vmatpush1.bf16.msra.mxu1 %v4253_v48  ;;  %2874 = vmatprep.mubr.bf16.mxu1 %v4342_v57 }
 0x142   : > { %2848 = vmatprep.subr.bf16.mxu1 %v4261_v51 }
 0x145   : > { %2849 = vmatpush1.bf16.msra.mxu1 %v4259_v53 }
 0x146   : > { %2850 = vmatprep.subr.bf16.mxu1 %v4267_v54 }
 0x149   : > { %2851 = vmatpush1.bf16.msra.mxu1 %v4265_v55 }
 0x14a   : > { %2852 = vmatprep.subr.bf16.mxu1 %v4273_v56 }
 0x14d   : > { %2853 = vmatpush1.bf16.msra.mxu1 %v4271_v58 }
 0x14e   : > { %2854 = vmatprep.subr.bf16.mxu1 %v4279_v59 }
 0x151   : > { %2855 = vmatpush1.bf16.msra.mxu1 %v4277_v60 }
 0x152   : > { %2856 = vmatprep.subr.bf16.mxu1 %v4285_v61 }
 0x155   : > { %2857 = vmatpush1.bf16.msra.mxu1 %v4283_v62 }
 0x156   : > { %2858 = vmatprep.subr.bf16.mxu1 %v4291_v63 }
 0x159   : > { %2859 = vmatpush2.bf16.msra.mxu1 %v4289_v0 }
 0x15a   : > { %2860 = vmatprep.subr.bf16.mxu1 %v4297_v1 }
 0x15c   : > { %v1680_v8 = vpop.f32.mrf.mxu1 }
 0x15d   : > { %2861 = vmatpush2.bf16.msra.mxu1 %v4295_v2  ;;  %v1681_v37 = vadd.f32 %v1680_v8, %v1223_v31 }
 0x15e   : > { %2862 = vmatprep.subr.bf16.mxu1 %v4303_v3  ;;  %v1682_v11 = vpop.f32.mrf.mxu1 }
 0x15f   : > { %v1683_v35 = vadd.f32 %v1682_v11, %v1227_v29 }
 0x160   : > { %v1684_v15 = vpop.f32.mrf.mxu1 }
 0x161   : > { %2863 = vmatpush2.bf16.msra.mxu1 %v4301_v4  ;;  %v1685_v36 = vadd.f32 %v1684_v15, %v1223_v31 }
 0x162   : > { %2864 = vmatprep.subr.bf16.mxu1 %v4309_v5  ;;  %v1686_v20 = vpop.f32.mrf.mxu1  ;;  %v4238_v5 = vld [vmem:[%s5773_s5 + $0x70] ss:$8 sps:$4 sm:$0xff]  }
 0x163   : > { %v1687_v39 = vadd.f32 %v1686_v20, %v1227_v29 }
 0x164   : > { %v1690_v26 = vpop.f32.mrf.mxu1 }
 0x165   : > { %2865 = vmatpush2.bf16.msra.mxu1 %v4307_v6  ;;  %v1691_v58 = vadd.f32 %v1690_v26, %v1223_v31 }
 0x166   : > { %2866 = vmatprep.subr.bf16.mxu1 %v4315_v7  ;;  %v1692_v33 = vpop.f32.mrf.mxu1 }
 0x167   : > { %v1693_v55 = vadd.f32 %v1692_v33, %v1227_v29  ;;  %v4276_v33 = vld [vmem:[%s5773_s5 + $0x14] ss:$8 sps:$4 sm:$0xff]  }
 0x168   : > { %v1694_v40 = vpop.f32.mrf.mxu1 }
 0x169   : > { %2867 = vmatpush2.bf16.msra.mxu1 %v4313_v9  ;;  %v1695_v56 = vadd.f32 %v1694_v40, %v1223_v31  ;;  %v4246_v9 = vld [vmem:[%s5773_s5 + $0x64] ss:$8 sps:$4 sm:$0xff]   ;;  %v4292_v40 = vld [vmem:[%s5773_s5 + $0xe0] ss:$8 sps:$4 sm:$0xff]  }
 0x16a   : > { %v1733_v13 = vpop.f32.mrf.mxu0  ;;  %2868 = vmatprep.subr.bf16.mxu1 %v4321_v10  ;;  %v1696_v51 = vpop.f32.mrf.mxu1  ;;  %v4270_v31 = vld [vmem:[%s5773_s5 + $0x24] ss:$8 sps:$4 sm:$0xff]  }
 0x16b   : > { %v1734_v45 = vadd.f32 %v1733_v13, %v1681_v37  ;;  %v1697_v61 = vadd.f32 %v1696_v51, %v1227_v29  ;;  %v4264_v29 = vld [vmem:[%s5773_s5 + $0x34] ss:$8 sps:$4 sm:$0xff]   ;;  %v4322_v51 = vld [vmem:[%s5773_s5 + $0x90] ss:$8 sps:$4 sm:$0xff]  }
 0x16c   : > { %v1735_v16 = vpop.f32.mrf.mxu0  ;;  %v4288_v37 = vld [vmem:[%s5773_s5 + $0xf4] ss:$8 sps:$4 sm:$0xff]  }
 0x16d   : > { %2869 = vmatpush2.bf16.msra.mxu1 %v4319_v12  ;;  %v1736_v43 = vadd.f32 %v1735_v16, %v1683_v35  ;;  %v4244_v16 = vld [vmem:[%s5773_s5 + $0x60] ss:$8 sps:$4 sm:$0xff]   ;;  %v4282_v35 = vld [vmem:[%s5773_s5 + $0x4] ss:$8 sps:$4 sm:$0xff]  }
 0x16e   : > { %v1737_v18 = vpop.f32.mrf.mxu0  ;;  %2870 = vmatprep.subr.bf16.mxu1 %v4327_v14 }
 0x16f   : > { %v1738_v44 = vadd.f32 %v1737_v18, %v1685_v36  ;;  %v4252_v18 = vld [vmem:[%s5773_s5 + $0x54] ss:$8 sps:$4 sm:$0xff]   ;;  %v4280_v36 = vld [vmem:[%s5773_s5] ss:$8 sps:$4 sm:$0xff]  }
 0x170   : > { %v1739_v21 = vpop.f32.mrf.mxu0 }
 0x171   : > { %2871 = vmatpush2.bf16.msra.mxu1 %v4325_v17  ;;  %v1740_v47 = vadd.f32 %v1739_v21, %v1687_v39  ;;  %v4294_v39 = vld [vmem:[%s5773_s5 + $0xe4] ss:$8 sps:$4 sm:$0xff]  }
 0x172   : > { %v1743_v24 = vpop.f32.mrf.mxu0  ;;  %2872 = vmatprep.subr.bf16.mxu1 %v4333_v19 }
 0x173   : > { %v1744_v6 = vadd.f32 %v1743_v24, %v1691_v58  ;;  %v4250_v24 = vld [vmem:[%s5773_s5 + $0x50] ss:$8 sps:$4 sm:$0xff]   ;;  %v4346_v58 = vld [vmem:[%s5334_s13 + $0x2c] ss:$20 sps:$4 sm:$0xff]  }
 0x174   : > { %v1745_v27 = vpop.f32.mrf.mxu0 }
 0x175   : > { %2873 = vmatpush2.bf16.msra.mxu1 %v4331_v22  ;;  %v1746_v2 = vadd.f32 %v1745_v27, %v1693_v55  ;;  %v4258_v27 = vld [vmem:[%s5773_s5 + $0x44] ss:$8 sps:$4 sm:$0xff]   ;;  %v4339_v55 = vld [vmem:[%s5773_s5 + $0x234] ss:$8 sps:$4 sm:$0xff]  }
 0x176   : > { %v1747_v32 = vpop.f32.mrf.mxu0 }
 0x177   : > { %v1748_v3 = vadd.f32 %v1747_v32, %v1695_v56  ;;  %v4268_v32 = vld [vmem:[%s5773_s5 + $0x20] ss:$8 sps:$4 sm:$0xff]  }
 0x178   : > { %v1749_v34 = vpop.f32.mrf.mxu0  ;;  %2875 = vmatmul.mubr.bf16.vlgmr.msra.gmra.mxu1 %v4340_v28  ;;  %v4256_v28 = vld [vmem:[%s5773_s5 + $0x40] ss:$8 sps:$4 sm:$0xff]  }
 0x179   : > { %2884 = vmatprep.mubr.bf16.mxu1 %v4352_v30  ;;  %v1750_v10 = vadd.f32 %v1749_v34, %v1697_v61  ;;  %v4262_v30 = vld [vmem:[%s5773_s5 + $0x30] ss:$8 sps:$4 sm:$0xff]   ;;  %v4334_v56 = vld [vmem:[%s5334_s13] ss:$20 sps:$4 sm:$0xff]  }
 0x17a   : > { %v1786_v38 = vpop.f32.mrf.mxu0  ;;  %v4274_v34 = vld [vmem:[%s5773_s5 + $0x10] ss:$8 sps:$4 sm:$0xff]   ;;  %v4351_v61 = vld [vmem:[%s5773_s5 + $0x214] ss:$8 sps:$4 sm:$0xff]  }
 0x17b   : > { %v1787_v53 = vadd.f32 %v1786_v38, %v1734_v45  ;;  %v4286_v38 = vld [vmem:[%s5773_s5 + $0xf0] ss:$8 sps:$4 sm:$0xff]   ;;  %v4312_v45 = vld [vmem:[%s5773_s5 + $0xb4] ss:$8 sps:$4 sm:$0xff]  }
 0x17c   : > { %v1788_v41 = vpop.f32.mrf.mxu0 }
 0x17d   : > { %v1789_v48 = vadd.f32 %v1788_v41, %v1736_v43  ;;  %v1805_v0 = vmax.f32 %v1787_v53, 0.0  ;;  %v4300_v41 = vld [vmem:[%s5773_s5 + $0xd4] ss:$8 sps:$4 sm:$0xff]   ;;  %v4306_v43 = vld [vmem:[%s5773_s5 + $0xc4] ss:$8 sps:$4 sm:$0xff]  }
 0x17e   : > { %v1790_v46 = vpop.f32.mrf.mxu0  ;;  %v4330_v53 = vld [vmem:[%s5773_s5 + $0x84] ss:$8 sps:$4 sm:$0xff]  }
 0x17f   : > { %v1791_v49 = vadd.f32 %v1790_v46, %v1738_v44  ;;  %v1806_v62 = vmax.f32 %v1789_v48, 0.0  ;;  %v4304_v44 = vld [vmem:[%s5773_s5 + $0xc0] ss:$8 sps:$4 sm:$0xff]   ;;  %v4310_v46 = vld [vmem:[%s5773_s5 + $0xb0] ss:$8 sps:$4 sm:$0xff]  }
 0x180   : > { %v1792_v54 = vpop.f32.mrf.mxu0  ;;  %2885 = vmatmul.mubr.bf16.gmra.mxu1 %v4354_v42  ;;  %v4298_v42 = vld [vmem:[%s5773_s5 + $0xd0] ss:$8 sps:$4 sm:$0xff]   ;;  %v4316_v48 = vld [vmem:[%s5773_s5 + $0xa0] ss:$8 sps:$4 sm:$0xff]  }
 0x181   : > { %v1793_v57 = vadd.f32 %v1792_v54, %v1740_v47  ;;  %v1807_v59 = vmax.f32 %v1791_v49, 0.0  ;;  %v4318_v47 = vld [vmem:[%s5773_s5 + $0xa4] ss:$8 sps:$4 sm:$0xff]   ;;  %v4324_v49 = vld [vmem:[%s5773_s5 + $0x94] ss:$8 sps:$4 sm:$0xff]  }
 0x182   : > { %v1796_v60 = vpop.f32.mrf.mxu0  ;;  %v4328_v54 = vld [vmem:[%s5773_s5 + $0x80] ss:$8 sps:$4 sm:$0xff]  }
 0x183   : > { %v1808_v63 = vmax.f32 %v1793_v57, 0.0  ;;  %v1813_v7 = vpack.c.bf16 %v1807_v59, %v1805_v0  ;;  %v1797_v13 = vadd.f32 %v1796_v60, %v1744_v6  ;;  %v4337_v57 = vld [vmem:[%s5773_s5 + $0x230] ss:$8 sps:$4 sm:$0xff]   ;;  %v4345_v59 = vld [vmem:[%s5773_s5 + $0x224] ss:$8 sps:$4 sm:$0xff]  }
 0x184   : > { %v1798_v1 = vpop.f32.mrf.mxu0  ;;  %v4343_v60 = vld [vmem:[%s5773_s5 + $0x220] ss:$8 sps:$4 sm:$0xff]   ;;  %v4357_v0 = vld [vmem:[%s5773_s5 + $0x204] ss:$8 sps:$4 sm:$0xff]  }
 0x185   : > { %v1814_v4 = vpack.c.bf16 %v1808_v63, %v1806_v62  ;;  %v1799_v11 = vadd.f32 %v1798_v1, %v1746_v2  ;;  %v1809_v21 = vmax.f32 %v1797_v13, 0.0  ;;  %v4348_v62 = vld [vmem:[%s5334_s13 + $0x28] ss:$20 sps:$4 sm:$0xff]   ;;  %v4349_v63 = vld [vmem:[%s5773_s5 + $0x210] ss:$8 sps:$4 sm:$0xff]  }
 0x186   : > { %v1800_v8 = vpop.f32.mrf.mxu0  ;;  %v4355_v1 = vld [vmem:[%s5773_s5 + $0x200] ss:$8 sps:$4 sm:$0xff]   ;;  %v4358_v2 = vld [vmem:[%s5334_s13 + $0x10] ss:$20 sps:$4 sm:$0xff]  }
 0x187   : > { %v1801_v12 = vadd.f32 %v1800_v8, %v1748_v3  ;;  %2042 = vmatprep.mubr.bf16.mxu0 %v1814_v4  ;;  %v1810_v19 = vmax.f32 %v1799_v11, 0.0  ;;  %v4360_v3 = vld [vmem:[%s5775_s7 + $0x270] ss:$8 sps:$4 sm:$0xff]   ;;  %v4362_v4 = vld [vmem:[%s5775_s7 + $0x274] ss:$8 sps:$4 sm:$0xff]  }
 0x188   : > { %v1802_v14 = vpop.f32.mrf.mxu0  ;;  %2043 = vmatmul.mubr.bf16.vlgmr.msra.gmra.mxu0 %v1813_v7  ;;  %3153 = vmatprep.subr.bf16.mxu1 %v4362_v4  ;;  %v4363_v6 = vld [vmem:[%s5775_s7 + $0x260] ss:$8 sps:$4 sm:$0xff]   ;;  %v4368_v7 = vld [vmem:[%s5775_s7 + $0x254] ss:$8 sps:$4 sm:$0xff]   ;;  %v4359_v8 = vld [vmem:[%s5334_s13 + $0x38] ss:$20 sps:$4 sm:$0xff]  }
 0x189   : > { %v1803_v15 = vadd.f32 %v1802_v14, %v1750_v10  ;;  %2790 = vmatpush1.bf16.msra.mxu0 %v4238_v5  ;;  %v1811_v17 = vmax.f32 %v1801_v12, 0.0  ;;  %v4365_v5 = vld [vmem:[%s5775_s7 + $0x264] ss:$8 sps:$4 sm:$0xff]   ;;  %3154 = vmatpush1.bf16.msra.mxu1 %v4360_v3  ;;  %v4369_v10 = vld [vmem:[%s5775_s7 + $0x240] ss:$8 sps:$4 sm:$0xff]   ;;  %s5717_s13 = scalar_lea.sflag [#allocation3], %s379_s16 }
 0x18a   : > { %2791 = vmatprep.subr.bf16.mxu0 %v4246_v9  ;;  %3155 = vmatprep.subr.bf16.mxu1 %v4365_v5  ;;  %v4366_v9 = vld [vmem:[%s5775_s7 + $0x250] ss:$8 sps:$4 sm:$0xff]   ;;  %v4374_v11 = vld [vmem:[%s5775_s7 + $0x234] ss:$8 sps:$4 sm:$0xff]   ;;  %v4377_v13 = vld [vmem:[%s5775_s7 + $0x224] ss:$8 sps:$4 sm:$0xff]  }
 0x18b   : > { %v1812_v20 = vmax.f32 %v1803_v15, 0.0  ;;  %v1815_v26 = vpack.c.bf16 %v1811_v17, %v1809_v21  ;;  %v4372_v12 = vld [vmem:[%s5775_s7 + $0x230] ss:$8 sps:$4 sm:$0xff]   ;;  %v4375_v14 = vld [vmem:[%s5775_s7 + $0x220] ss:$8 sps:$4 sm:$0xff]  }
 0x18c   : > { %v4380_v15 = vld [vmem:[%s5775_s7 + $0x214] ss:$8 sps:$4 sm:$0xff]   ;;  %v4383_v17 = vld [vmem:[%s5775_s7 + $0x204] ss:$8 sps:$4 sm:$0xff]  }
 0x18d   : > { %v1816_v22 = vpack.c.bf16 %v1812_v20, %v1810_v19  ;;  %2792 = vmatpush1.bf16.msra.mxu0 %v4244_v16  ;;  %3156 = vmatpush1.bf16.msra.mxu1 %v4363_v6  ;;  %v4378_v16 = vld [vmem:[%s5775_s7 + $0x210] ss:$8 sps:$4 sm:$0xff]   ;;  %v4386_v19 = vld [vmem:[%s5775_s7 + $0x2f4] ss:$8 sps:$4 sm:$0xff]   ;;  %v4389_v21 = vld [vmem:[%s5775_s7 + $0x2e4] ss:$8 sps:$4 sm:$0xff]  }
 0x18e   : > { %2793 = vmatprep.subr.bf16.mxu0 %v4252_v18  ;;  %3157 = vmatprep.subr.bf16.mxu1 %v4368_v7  ;;  %v4381_v18 = vld [vmem:[%s5775_s7 + $0x200] ss:$8 sps:$4 sm:$0xff]   ;;  %v4384_v20 = vld [vmem:[%s5775_s7 + $0x2f0] ss:$8 sps:$4 sm:$0xff]  }
 0x18f   : > { %2052 = vmatprep.mubr.bf16.mxu0 %v1816_v22  ;;  %v4387_v22 = vld [vmem:[%s5775_s7 + $0x2e0] ss:$8 sps:$4 sm:$0xff]  }
 0x190   : > { %2053 = vmatmul.mubr.bf16.gmra.mxu0 %v1815_v26  ;;  %v4395_v26 = vld [vmem:[%s5775_s7 + $0x2c4] ss:$8 sps:$4 sm:$0xff]  }
 0x191   : > { %2794 = vmatpush1.bf16.msra.mxu0 %v4250_v24  ;;  %2821 = vmatprep.mubr.bf16.mxu0 %v4336_v25  ;;  %v4392_v24 = vld [vmem:[%s5775_s7 + $0x2d4] ss:$8 sps:$4 sm:$0xff]   ;;  %v4390_v25 = vld [vmem:[%s5775_s7 + $0x2d0] ss:$8 sps:$4 sm:$0xff]  }
 0x192   : > { %2795 = vmatprep.subr.bf16.mxu0 %v4258_v27  ;;  %3158 = vmatpush1.bf16.msra.mxu1 %v4366_v9  ;;  %v4393_v27 = vld [vmem:[%s5775_s7 + $0x2c0] ss:$8 sps:$4 sm:$0xff]  }
 0x195   : > { %2796 = vmatpush1.bf16.msra.mxu0 %v4256_v28  ;;  %v4398_v28 = vld [vmem:[%s5775_s7 + $0x2b4] ss:$8 sps:$4 sm:$0xff]  }
 0x196   : > { %2797 = vmatprep.subr.bf16.mxu0 %v4264_v29  ;;  %v4396_v29 = vld [vmem:[%s5775_s7 + $0x2b0] ss:$8 sps:$4 sm:$0xff]  }
 0x199   : > { %2798 = vmatpush1.bf16.msra.mxu0 %v4262_v30  ;;  %v4401_v30 = vld [vmem:[%s5775_s7 + $0x2a4] ss:$8 sps:$4 sm:$0xff]  }
 0x19a   : > { %2799 = vmatprep.subr.bf16.mxu0 %v4270_v31  ;;  %v4399_v31 = vld [vmem:[%s5775_s7 + $0x2a0] ss:$8 sps:$4 sm:$0xff]  }
 0x19d   : > { %2800 = vmatpush1.bf16.msra.mxu0 %v4268_v32  ;;  %v4404_v32 = vld [vmem:[%s5775_s7 + $0x294] ss:$8 sps:$4 sm:$0xff]  }
 0x19e   : > { %2801 = vmatprep.subr.bf16.mxu0 %v4276_v33  ;;  %v4402_v33 = vld [vmem:[%s5775_s7 + $0x290] ss:$8 sps:$4 sm:$0xff]  }
 0x1a1   : > { %2802 = vmatpush1.bf16.msra.mxu0 %v4274_v34  ;;  %v4407_v34 = vld [vmem:[%s5775_s7 + $0x284] ss:$8 sps:$4 sm:$0xff]  }
 0x1a2   : > { %2803 = vmatprep.subr.bf16.mxu0 %v4282_v35  ;;  %v4405_v35 = vld [vmem:[%s5775_s7 + $0x280] ss:$8 sps:$4 sm:$0xff]  }
 0x1a5   : > { %2804 = vmatpush1.bf16.msra.mxu0 %v4280_v36 }
 0x1a6   : > { %2805 = vmatprep.subr.bf16.mxu0 %v4288_v37 }
 0x1a9   : > { %2806 = vmatpush2.bf16.msra.mxu0 %v4286_v38 }
 0x1aa   : > { %2807 = vmatprep.subr.bf16.mxu0 %v4294_v39 }
 0x1ad   : > { %2808 = vmatpush2.bf16.msra.mxu0 %v4292_v40 }
 0x1ae   : > { %2809 = vmatprep.subr.bf16.mxu0 %v4300_v41 }
 0x1b1   : > { %2810 = vmatpush2.bf16.msra.mxu0 %v4298_v42 }
 0x1b2   : > { %2811 = vmatprep.subr.bf16.mxu0 %v4306_v43 }
 0x1b5   : > { %2812 = vmatpush2.bf16.msra.mxu0 %v4304_v44 }
 0x1b6   : > { %2813 = vmatprep.subr.bf16.mxu0 %v4312_v45 }
 0x1b9   : > { %2814 = vmatpush2.bf16.msra.mxu0 %v4310_v46 }
 0x1ba   : > { %2815 = vmatprep.subr.bf16.mxu0 %v4318_v47 }
 0x1bd   : > { %2816 = vmatpush2.bf16.msra.mxu0 %v4316_v48 }
 0x1be   : > { %2817 = vmatprep.subr.bf16.mxu0 %v4324_v49 }
 0x1c1   : > { %2818 = vmatpush2.bf16.msra.mxu0 %v4322_v51 }
 0x1c2   : > { %2819 = vmatprep.subr.bf16.mxu0 %v4330_v53 }
 0x1c5   : > { %2820 = vmatpush2.bf16.msra.mxu0 %v4328_v54 }
 0x1c6   : > { %2903 = vmatprep.subr.bf16.mxu0 %v4339_v55 }
 0x1c8   : > { %2822 = vmatmul.mubr.bf16.vlgmr.msra.gmra.mxu0 %v4334_v56 }
 0x1c9   : > { %2904 = vmatpush1.bf16.msra.mxu0 %v4337_v57  ;;  %2831 = vmatprep.mubr.bf16.mxu0 %v4346_v58 }
 0x1ca   : > { %2905 = vmatprep.subr.bf16.mxu0 %v4345_v59 }
 0x1cd   : > { %2906 = vmatpush1.bf16.msra.mxu0 %v4343_v60 }
 0x1ce   : > { %2907 = vmatprep.subr.bf16.mxu0 %v4351_v61 }
 0x1d0   : > { %2832 = vmatmul.mubr.bf16.gmra.mxu0 %v4348_v62 }
 0x1d1   : > { %2908 = vmatpush1.bf16.msra.mxu0 %v4349_v63  ;;  %2927 = vmatprep.mubr.bf16.mxu0 %v4502_v23  ;;  %v3664_v63 = vld [vmem:[%s5774_s6 + $0x2] ss:$4 sm:$0x3] }
 0x1d2   : > { %2909 = vmatprep.subr.bf16.mxu0 %v4357_v0  ;;  %v2366_v3 = vrot.slane %v3664_v63, %v5302_v52 }
 0x1d5   : > { %2910 = vmatpush1.bf16.msra.mxu0 %v4355_v1 }
 0x1d8   : > { %3747 = vmatmul.mubr.msk.bf16.vlgmr.msra.gmra.mxu0 %vm923_vm0, %v4358_v2  ;;  %v2370_v2 = vrot.slane %v3664_v63, %v5297_v50 }
 0x1d9   : > { %2937 = vmatprep.mubr.bf16.mxu0 %v4502_v23  ;;  %v4371_v23 = vld [vmem:[%s5775_s7 + $0x244] ss:$8 sps:$4 sm:$0xff]  }
 0x1da   : > { %3159 = vmatprep.subr.bf16.mxu1 %v4371_v23 }
 0x1db   : > { %3160 = vmatpush1.bf16.msra.mxu1 %v4369_v10 }
 0x1dc   : > { %3161 = vmatprep.subr.bf16.mxu1 %v4374_v11 }
 0x1df   : > { %3162 = vmatpush1.bf16.msra.mxu1 %v4372_v12 }
 0x1e0   : > { %3748 = vmatmul.mubr.msk.bf16.gmra.mxu0 %vm923_vm0, %v4359_v8  ;;  %3163 = vmatprep.subr.bf16.mxu1 %v4377_v13 }
 0x1e3   : > { %3164 = vmatpush1.bf16.msra.mxu1 %v4375_v14 }
 0x1e4   : > { %3165 = vmatprep.subr.bf16.mxu1 %v4380_v15 }
 0x1e7   : > { %3166 = vmatpush1.bf16.msra.mxu1 %v4378_v16 }
 0x1e8   : > { %3167 = vmatprep.subr.bf16.mxu1 %v4383_v17 }
 0x1eb   : > { %3168 = vmatpush1.bf16.msra.mxu1 %v4381_v18 }
 0x1ec   : > { %3169 = vmatprep.subr.bf16.mxu1 %v4386_v19 }
 0x1ef   : > { %3170 = vmatpush2.bf16.msra.mxu1 %v4384_v20 }
 0x1f0   : > { %3171 = vmatprep.subr.bf16.mxu1 %v4389_v21 }
 0x1f3   : > { %3172 = vmatpush2.bf16.msra.mxu1 %v4387_v22 }
 0x1f4   : > { %3173 = vmatprep.subr.bf16.mxu1 %v4392_v24 }
 0x1f7   : > { %3174 = vmatpush2.bf16.msra.mxu1 %v4390_v25 }
 0x1f8   : > { %3175 = vmatprep.subr.bf16.mxu1 %v4395_v26  ;;  %v5637_v36 = vpop.f32.mrf.mxu1 }
 0x1fa   : > { %v5639_v37 = vpop.f32.mrf.mxu1 }
 0x1fb   : > { %3176 = vmatpush2.bf16.msra.mxu1 %v4393_v27 }
 0x1fc   : > { %3177 = vmatprep.subr.bf16.mxu1 %v4398_v28  ;;  %v5641_v38 = vpop.f32.mrf.mxu1 }
 0x1fe   : > { %v5643_v39 = vpop.f32.mrf.mxu1 }
 0x1ff   : > { %3178 = vmatpush2.bf16.msra.mxu1 %v4396_v29 }
 0x200   : > { %3179 = vmatprep.subr.bf16.mxu1 %v4401_v30  ;;  %v5647_v41 = vpop.f32.mrf.mxu1 }
 0x202   : > { %v5653_v44 = vpop.f32.mrf.mxu1 }
 0x203   : > { %3180 = vmatpush2.bf16.msra.mxu1 %v4399_v31 }
 0x204   : > { %3181 = vmatprep.subr.bf16.mxu1 %v4404_v32  ;;  %v5659_v47 = vpop.f32.mrf.mxu1 }
 0x206   : > { %v2273_v51 = vpop.f32.mrf.mxu1 }
 0x207   : > { %3182 = vmatpush2.bf16.msra.mxu1 %v4402_v33 }
 0x208   : > { %3183 = vmatprep.subr.bf16.mxu1 %v4407_v34 }
 0x20b   : > { %3184 = vmatpush2.bf16.msra.mxu1 %v4405_v35 }
 0x238   : > { %v2876_v55 = vpop.f32.mrf.mxu1 }
 0x23a   : > { %v2878_v58 = vpop.f32.mrf.mxu1 }
 0x23c   : > { %v2880_v61 = vpop.f32.mrf.mxu1 }
 0x23e   : > { %v2882_v0 = vpop.f32.mrf.mxu1 }
 0x240   : > { %v2886_v5 = vpop.f32.mrf.mxu1 }
 0x242   : > { %v2888_v11 = vpop.f32.mrf.mxu1 }
 0x244   : > { %v2890_v20 = vpop.f32.mrf.mxu1 }
 0x246   : > { %v2892_v33 = vpop.f32.mrf.mxu1 }
 0x248   : > { %v5645_v40 = vpop.f32.mrf.mxu0 }
 0x24a   : > { %v5649_v42 = vpop.f32.mrf.mxu0 }
 0x24c   : > { %v5651_v43 = vpop.f32.mrf.mxu0 }
 0x24e   : > { %v5655_v45 = vpop.f32.mrf.mxu0 }
 0x250   : > { %v5657_v46 = vpop.f32.mrf.mxu0 }
 0x252   : > { %v5661_v48 = vpop.f32.mrf.mxu0 }
 0x254   : > { %v5663_v49 = vpop.f32.mrf.mxu0 }
 0x256   : > { %v2060_v53 = vpop.f32.mrf.mxu0 }
 0x257   : > { %v5665_v54 = vadd.f32 %v2273_v51, %v2060_v53 }
 0x288   : > { %v2823_v56 = vpop.f32.mrf.mxu0 }
 0x289   : > { %v2824_v9 = vadd.f32 %v2823_v56, %v2366_v3 }
 0x28a   : > { %v2825_v57 = vpop.f32.mrf.mxu0 }
 0x28b   : > { %v2826_v7 = vadd.f32 %v2825_v57, %v2370_v2  ;;  %v2877_v15 = vadd.f32 %v2876_v55, %v2824_v9 }
 0x28c   : > { %v2827_v59 = vpop.f32.mrf.mxu0 }
 0x28d   : > { %v2828_v8 = vadd.f32 %v2827_v59, %v2366_v3  ;;  %v2879_v13 = vadd.f32 %v2878_v58, %v2826_v7 }
 0x28e   : > { %v2829_v60 = vpop.f32.mrf.mxu0 }
 0x28f   : > { %v2830_v10 = vadd.f32 %v2829_v60, %v2370_v2  ;;  %v2881_v14 = vadd.f32 %v2880_v61, %v2828_v8  ;;  %v2258_v8 = vadd.f32 %v5637_v36, %v5645_v40  ;;  %v2264_v40 = vadd.f32 %v5643_v39, %v5655_v45 }
 0x290   : > { %v2833_v62 = vpop.f32.mrf.mxu0  ;;  %v2270_v45 = vadd.f32 %v5653_v44, %v5661_v48 }
 0x291   : > { %v2883_v17 = vadd.f32 %v2882_v0, %v2830_v10  ;;  %v2834_v27 = vadd.f32 %v2833_v62, %v2366_v3  ;;  %v2260_v10 = vadd.f32 %v5639_v37, %v5649_v42  ;;  %v2268_v42 = vadd.f32 %v5647_v41, %v5657_v46 }
 0x292   : > { %v2835_v1 = vpop.f32.mrf.mxu0  ;;  %v2272_v41 = vadd.f32 %v5659_v47, %v5663_v49 }
 0x293   : > { %v2836_v24 = vadd.f32 %v2835_v1, %v2370_v2  ;;  %v2887_v56 = vadd.f32 %v2886_v5, %v2834_v27  ;;  %v3813_v5 = vld [vmem:[%s5774_s6 + $0x3] ss:$4 sm:$0x3] }
 0x294   : > { %v2837_v4 = vpop.f32.mrf.mxu0  ;;  %v3220_v9 = vrot.slane %v3813_v5, %v5302_v52 }
 0x295   : > { %v2838_v25 = vadd.f32 %v2837_v4, %v2366_v3  ;;  %v2889_v51 = vadd.f32 %v2888_v11, %v2836_v24 }
 0x296   : > { %v2839_v6 = vpop.f32.mrf.mxu0 }
 0x297   : > { %v2840_v30 = vadd.f32 %v2839_v6, %v2370_v2  ;;  %v2891_v53 = vadd.f32 %v2890_v20, %v2838_v25 }
 0x298   : > { %v2929_v23 = vpop.f32.mrf.mxu0 }
 0x299   : > { %v2930_v21 = vadd.f32 %v2929_v23, %v2877_v15  ;;  %v2893_v59 = vadd.f32 %v2892_v33, %v2840_v30 }
 0x29a   : > { %v2931_v12 = vpop.f32.mrf.mxu0 }
 0x29b   : > { %v2932_v18 = vadd.f32 %v2931_v12, %v2879_v13  ;;  %v2948_v34 = vmax.f32 %v2930_v21, 0.0  ;;  %v3224_v12 = vrot.slane %v3813_v5, %v5297_v50 }
 0x29c   : > { %v2933_v16 = vpop.f32.mrf.mxu0 }
 0x29d   : > { %v2934_v19 = vadd.f32 %v2933_v16, %v2881_v14  ;;  %v2949_v31 = vmax.f32 %v2932_v18, 0.0  ;;  %v2262_v14 = vadd.f32 %v5641_v38, %v5651_v43 }
 0x29e   : > { %v2935_v22 = vpop.f32.mrf.mxu0 }
 0x29f   : > { %v2936_v26 = vadd.f32 %v2935_v22, %v2883_v17  ;;  %v2950_v28 = vmax.f32 %v2934_v19, 0.0 }
 0x2a0   : > { %v2939_v29 = vpop.f32.mrf.mxu0 }
 0x2a1   : > { %v2951_v32 = vmax.f32 %v2936_v26, 0.0  ;;  %v2956_v57 = vpack.c.bf16 %v2950_v28, %v2948_v34  ;;  %v2940_v62 = vadd.f32 %v2939_v29, %v2887_v56 }
 0x2a2   : > { %v2941_v35 = vpop.f32.mrf.mxu0 }
 0x2a3   : > { %v2957_v55 = vpack.c.bf16 %v2951_v32, %v2949_v31  ;;  %v2942_v60 = vadd.f32 %v2941_v35, %v2889_v51  ;;  %v2952_v4 = vmax.f32 %v2940_v62, 0.0 }
 0x2a4   : > { %v2943_v58 = vpop.f32.mrf.mxu0 }
 0x2a5   : > { %v2944_v61 = vadd.f32 %v2943_v58, %v2891_v53  ;;  %3185 = vmatprep.mubr.bf16.mxu1 %v2957_v55  ;;  %v2953_v2 = vmax.f32 %v2942_v60, 0.0 }
 0x2a6   : > { %v2945_v63 = vpop.f32.mrf.mxu0  ;;  %3186 = vmatmul.mubr.bf16.vlgmr.msra.gmra.mxu1 %v2956_v57 }
 0x2a7   : > { %v2946_v0 = vadd.f32 %v2945_v63, %v2893_v59  ;;  %v2954_v1 = vmax.f32 %v2944_v61, 0.0 }
 0x2a9   : > { %v2955_v3 = vmax.f32 %v2946_v0, 0.0  ;;  %v2958_v7 = vpack.c.bf16 %v2954_v1, %v2952_v4 }
 0x2ab   : > { %v2959_v6 = vpack.c.bf16 %v2955_v3, %v2953_v2 }
 0x2ad   : > { %3195 = vmatprep.mubr.bf16.mxu1 %v2959_v6 }
 0x2ae   : > { %3196 = vmatmul.mubr.bf16.gmra.mxu1 %v2958_v7 }
 0x366   : > { %v3187_v23 = vpop.f32.mrf.mxu1 }
 0x367   : > { %v3206_v11 = vadd.f32 %v3187_v23, %v2258_v8 }
 0x368   : > { %v3189_v13 = vpop.f32.mrf.mxu1 }
 0x369   : > { %v3227_v15 = vadd.f32 %v3220_v9, %v3206_v11  ;;  %v3207_v16 = vadd.f32 %v3189_v13, %v2260_v10 }
 0x36a   : > { %v3191_v36 = vpop.f32.mrf.mxu1 }
 0x36b   : > { %3235 = vst [vmem:[%s5688_s20] sm:$0xff] %v3227_v15  ;;  %v3228_v52 = vadd.f32 %v3224_v12, %v3207_v16  ;;  %v3208_v50 = vadd.f32 %v3191_v36, %v2262_v14 }
 0x36c   : > { %v3193_v37 = vpop.f32.mrf.mxu1 }
 0x36d   : > { %3236 = vst [vmem:[%s5688_s20 + $0x8] sm:$0xff] %v3228_v52  ;;  %v3229_v38 = vadd.f32 %v3220_v9, %v3208_v50  ;;  %v3209_v43 = vadd.f32 %v3193_v37, %v2264_v40 }
 0x36e   : > { %v3197_v39 = vpop.f32.mrf.mxu1 }
 0x36f   : > { %3237 = vst [vmem:[%s5688_s20 + $0x10] sm:$0xff] %v3229_v38  ;;  %v3230_v17 = vadd.f32 %v3224_v12, %v3209_v43  ;;  %v3210_v18 = vadd.f32 %v3197_v39, %v2268_v42 }
 0x370   : > { %v3199_v19 = vpop.f32.mrf.mxu1 }
 0x371   : > { %3238 = vst [vmem:[%s5688_s20 + $0x18] sm:$0xff] %v3230_v17  ;;  %v3231_v46 = vadd.f32 %v3220_v9, %v3210_v18  ;;  %v3211_v20 = vadd.f32 %v3199_v19, %v2270_v45 }
 0x372   : > { %v3201_v21 = vpop.f32.mrf.mxu1 }
 0x373   : > { %3239 = vst [vmem:[%s5688_s20 + $0x20] sm:$0xff] %v3231_v46  ;;  %v3232_v22 = vadd.f32 %v3224_v12, %v3211_v20  ;;  %v3212_v44 = vadd.f32 %v3201_v21, %v2272_v41 }
 0x374   : > { %v3203_v48 = vpop.f32.mrf.mxu1 }
 0x375   : > { %3240 = vst [vmem:[%s5688_s20 + $0x28] sm:$0xff] %v3232_v22  ;;  %v3233_v24 = vadd.f32 %v3220_v9, %v3212_v44  ;;  %v3213_v25 = vadd.f32 %v3203_v48, %v5665_v54 }
 0x377   : > { %3241 = vst [vmem:[%s5688_s20 + $0x30] sm:$0xff] %v3233_v24  ;;  %v3234_v47 = vadd.f32 %v3224_v12, %v3213_v25 }
 0x379   : > { %3242 = vst [vmem:[%s5688_s20 + $0x38] sm:$0xff] %v3234_v47 }
 0x37a   : > { %4421 = shalt.err (!%p4418_p7)
}
 0x37b   : > { %s4422_s16 = scalar_lea.hbm %s5709_s25, 1024  ;;  %s4426_s15 = scalar_lea.hbm %s5776_s8, 4096 }
 0x37c   : > { %p4423_p9 = scmp.ne.s32.totalorder %s5709_s25, %s4422_s16  ;;  %p4427_p12 = scmp.lt.s32.totalorder %s5709_s25, %s5776_s8 }
 0x37d   : > { %p4428_p13 = scmp.lt.s32.totalorder %s4426_s15, %s4422_s16 }
 0x37e   : > { %p4424_p10 = pnand %p4423_p9, %p4602_p3 }
 0x37f   : > { %p4429_p0 = por %p4428_p13, %p4427_p12 }
 0x380   : > { %p4425_p11 = pneg %p4424_p10 }
 0x382   : > { %p4430_p1 = pnand %p4429_p0, %p4425_p11 }
 0x384   : > { %4433 = shalt.err (!%p4430_p1)
}
 0x385   : > { %s4504_s24 = smov 256   ;;  %s4505_s14 = smov 16  }
 0x386   : > { %3824 = dma.vmem_to_hbm [thread:$0]  (%p4602_p3), %s5711_s9, 1024, %s5709_s25, %s5717_s13, %s4504_s24, %s4504_s24, %s4505_s14  }
 0x387 PF: > { %p3830_p2 = scmp.ge.s32.totalorder %s4500_s12, 2  ;;  %s3275_s26 = sand.u32 1, %s4472_s27  }
 0x388   : > { %s3276_s17 = scalar_lea.sflag [#allocation3], %s3275_s26 }
 0x389   : > { %p3827_p4 = pnand %p3830_p2, %p4611_p8 }
 0x38b   : > { %p3828_p5 = pneg %p3827_p4 }
 0x38d   : > { %4467 = dma.done.wait (%p3828_p5), %s3276_s17, 1024  }
 0x38e   : > { %4469 = vsyncadd (%p3828_p5), %s3276_s17, 4294966272  ;;  %s21_s12 = sadd.s32 1, %s4500_s12   ;;  %s5785_s9 = sld [smem:[#allocation5_spill]] }
 0x38f   : > { %p18_p6 = scmp.ge.s32.totalorder %s21_s12, 6   ;;  %s5786_s18 = sld [smem:[#allocation6_spill]] }
 0x390   : > { %s5787_s11 = sld [smem:[#allocation7_spill]]  ;;  %s5788_s27 = smov %s4476_s28 }
 0x391   : > { %s5789_s28 = smov %s4480_s29  ;;  %s5790_s29 = smov %s4620_s23 }
 0x392   : > { %s5791_s30 = smov %s4492_s10  ;;  %20 = sbr.rel (!%p18_p6) target bundleno = 5 (0x5), region = 98 }
 0x395   : > { %s5792_s10 = smov %s5786_s18 }
 0x397   :  { %3281 = vsyncpa [#allocation3], 1 }
 0x398   :  { %3283 = vsyncpa [#allocation3 + $0x1], 1 }

</bundles_post_ra>
